<compile_context>
chip_gen: v7x
topology: tpu7x:2x2x1
jax: 0.10.0
libtpu: 0.0.40
codegen_flags: <defaults>
</compile_context>

<pallas_src>
import functools

import jax
import jax.numpy as jnp
from jax.experimental import pallas as pl
from jax.experimental.pallas import tpu as pltpu

NEG_INF = -1e30


def _masked_softmax_lastdim(s, mask):
    """Softmax over the last axis with a 0/1 mask broadcast along sublanes.

    Fully-masked rows come out uniform (matches the reference behavior)."""
    logits = jnp.where(mask != 0.0, s, NEG_INF)
    m = jnp.max(logits, axis=-1, keepdims=True)
    e = jnp.exp(logits - m)
    denom = jnp.sum(e, axis=-1, keepdims=True)
    return e * pl.reciprocal(denom, approx=True)


def _fuse_gate_head(x, y, wf_ref, bf_ref, wg_ref, gate_bias, mm_dtype, merge_fuse):
    """fuse/gate head with the concat folded into the weight slabs.

    cat = [x, y, x*y, x-y]  =>  cat @ Wf == x@(W1+W4) + y@(W2-W4) + (x*y)@W3
    wf_ref holds the precombined (3, H, H) slabs; wg_ref the (3, H) gate rows.
    """
    H = x.shape[-1]
    xy = x * y
    if merge_fuse:
        # H % 128 == 0: lane-aligned concat -> one K=3H MXU matmul.
        cat3 = jnp.concatenate([x, y, xy], axis=-1).astype(mm_dtype)     # (M, 3H)
        slab = wf_ref[...].reshape(3 * H, H).astype(mm_dtype)            # (3H, H)
        pre = jnp.dot(cat3, slab, preferred_element_type=jnp.float32)
    else:
        pre = jnp.dot(x.astype(mm_dtype), wf_ref[0].astype(mm_dtype),
                      preferred_element_type=jnp.float32)
        pre = pre + jnp.dot(y.astype(mm_dtype), wf_ref[1].astype(mm_dtype),
                            preferred_element_type=jnp.float32)
        pre = pre + jnp.dot(xy.astype(mm_dtype), wf_ref[2].astype(mm_dtype),
                            preferred_element_type=jnp.float32)
    fuse = jnp.tanh(pre + bf_ref[...])

    g = wg_ref[...]                                     # (3, H)
    z = x * g[0:1, :] + y * g[1:2, :] + xy * g[2:3, :]
    gate = jax.nn.sigmoid(jnp.sum(z, axis=-1, keepdims=True) + gate_bias)

    return gate * fuse + (1.0 - gate) * x


def _co_attention_kernel(ud_ref, uq_ref, dmask_ref, qmask_ref, w_ref,
                         wf_pq_ref, bf_pq_ref, wf_qp_ref, bf_qp_ref,
                         wg_pq_ref, wg_qp_ref, gbias_ref,
                         pprime_ref, qprime_ref, *,
                         mm_dtype, merge_fuse, transpose_scores):
    Bt, Ld, H = ud_ref.shape
    Lq = uq_ref.shape[1]

    ud = ud_ref[...]                       # (Bt, Ld, H)
    uq = uq_ref[...]                       # (Bt, Lq, H)
    dmask = dmask_ref[...]                 # (Bt, 1, Ld)
    qmask = qmask_ref[...]                 # (Bt, 1, Lq)
    w = w_ref[...].astype(mm_dtype)        # (H, H)

    # Flatten the batch block into the sublane axis for the weight matmuls.
    ud2 = ud.reshape(Bt * Ld, H)
    uq2 = uq.reshape(Bt * Lq, H)

    ud_w = jnp.maximum(jnp.dot(ud2.astype(mm_dtype), w,
                               preferred_element_type=jnp.float32), 0.0)
    uq_w = jnp.maximum(jnp.dot(uq2.astype(mm_dtype), w,
                               preferred_element_type=jnp.float32), 0.0)
    ud_w = ud_w.reshape(Bt, Ld, H).astype(mm_dtype)
    uq_w = uq_w.reshape(Bt, Lq, H).astype(mm_dtype)

    # Similarity.  Default: two NT MXU matmuls so neither softmaxed score
    # matrix needs an XLU transpose.  When Ld*Lq >= H^2 the duplicated einsum
    # is the dominant MXU cost, so compute once and transpose on the XLU.
    s_dq = jnp.einsum('bdh,bqh->bdq', ud_w, uq_w,
                      preferred_element_type=jnp.float32)   # (Bt, Ld, Lq)
    if transpose_scores:
        s_qd = jnp.swapaxes(s_dq, 1, 2)                     # (Bt, Lq, Ld)
    else:
        s_qd = jnp.einsum('bqh,bdh->bqd', uq_w, ud_w,
                          preferred_element_type=jnp.float32)

    a_p2q = _masked_softmax_lastdim(s_dq, qmask)   # softmax over query axis
    a_q2p = _masked_softmax_lastdim(s_qd, dmask)   # softmax over doc axis

    q_tilde = jnp.einsum('bdq,bqh->bdh', a_p2q.astype(mm_dtype),
                         uq.astype(mm_dtype),
                         preferred_element_type=jnp.float32)  # (Bt, Ld, H)
    p_tilde = jnp.einsum('bqd,bdh->bqh', a_q2p.astype(mm_dtype),
                         ud.astype(mm_dtype),
                         preferred_element_type=jnp.float32)  # (Bt, Lq, H)

    qt2 = q_tilde.reshape(Bt * Ld, H)
    pt2 = p_tilde.reshape(Bt * Lq, H)

    p_out = _fuse_gate_head(ud2, qt2, wf_pq_ref, bf_pq_ref, wg_pq_ref,
                            gbias_ref[0], mm_dtype, merge_fuse)
    q_out = _fuse_gate_head(uq2, pt2, wf_qp_ref, bf_qp_ref, wg_qp_ref,
                            gbias_ref[1], mm_dtype, merge_fuse)

    pprime_ref[...] = p_out.reshape(Bt, Ld, H).astype(pprime_ref.dtype)
    qprime_ref[...] = q_out.reshape(Bt, Lq, H).astype(qprime_ref.dtype)


def _combine_fuse_weight(w):
    """(4H, H) input-major fuse weight -> (3, H, H): [W1+W4, W2-W4, W3]."""
    h = w.shape[1]
    w1, w2, w3, w4 = w[0:h], w[h:2 * h], w[2 * h:3 * h], w[3 * h:4 * h]
    return jnp.stack([w1 + w4, w2 - w4, w3], axis=0)


def _combine_gate_weight(w):
    """(1, 4H) gate weight -> (3, H): [g1+g4, g2-g4, g3]."""
    h = w.shape[1] // 4
    g = w.reshape(4, h)
    return jnp.stack([g[0] + g[3], g[1] - g[3], g[2]], axis=0)


def _pad_axis(x, axis, multiple):
    size = x.shape[axis]
    pad = (-size) % multiple
    if pad == 0:
        return x
    widths = [(0, 0)] * x.ndim
    widths[axis] = (0, pad)
    return jnp.pad(x, widths)


def _pick_vmem_limit():
    """Scoped-VMEM limit: 64 MiB on v5e/v6e (128 MiB physical), ~45 MiB on v7x
    (64 MiB physical) so Mosaic keeps headroom for internal scratch."""
    try:
        cap = pltpu.get_tpu_info().vmem_capacity_bytes
        return min(64 * 1024 * 1024, int(0.7 * cap))
    except Exception:
        return 48 * 1024 * 1024


def _pick_block_b(B, Ld, Lq, H, vmem_limit_bytes):
    """Largest divisor of B whose per-step working set fits ~65% of the scoped
    VMEM budget, capped at B//2 so the batch grid axis always has >= 2 steps
    (lets v7x shard it across both TensorCores; a no-op on v5e/v6e)."""
    # Grid-invariant weights are single-buffered: shared W (H^2) + two fuse
    # slabs (3H^2 each) + biases / gate rows (~8H).
    weight_bytes = 4 * (7 * H * H + 8 * H)
    budget = int(0.65 * vmem_limit_bytes) - weight_bytes
    per_item = 4 * (
        2 * (Ld + Lq) * H + 2 * (Ld + Lq)   # double-buffered inputs (+ masks)
        + 2 * (Ld + Lq) * H                 # double-buffered outputs
        + 6 * (Ld + Lq) * H                 # f32 in-kernel temporaries
        + 4 * Ld * Lq)                      # score / exp matrices
    cap = max(1, budget // per_item)
    if B >= 2:
        cap = min(cap, B // 2)              # guarantee >= 2 grid steps
    cap = min(cap, B)
    bt = 1
    for cand in range(1, cap + 1):
        if B % cand == 0:
            bt = cand
    return bt


def co_attention(u_doc, u_query, doc_mask, query_mask, params,
                 block_b=None, matmul_dtype=jnp.float32,
                 merge_fuse=None, transpose_scores=None):
    B, Ld0, H = u_doc.shape
    Lq0 = u_query.shape[1]
    (w, wfpq, bfpq, wfqp, bfqp, wgpq, bgpq, wgqp, bgqp) = params

    # Pad sequence axes to the f32 sublane multiple so in-kernel reshapes and
    # batched einsums stay free views (padded rows/cols are masked out and the
    # padded outputs are sliced off below).
    SUB = 8
    u_doc_p = _pad_axis(u_doc, 1, SUB)
    u_query_p = _pad_axis(u_query, 1, SUB)
    dmask_p = _pad_axis(doc_mask.astype(jnp.float32), 1, SUB)
    qmask_p = _pad_axis(query_mask.astype(jnp.float32), 1, SUB)
    Ld = u_doc_p.shape[1]
    Lq = u_query_p.shape[1]

    # Host-side weight precombination (removes the in-kernel concatenations).
    wf_pq = _combine_fuse_weight(wfpq)          # (3, H, H)
    wf_qp = _combine_fuse_weight(wfqp)          # (3, H, H)
    wg_pq = _combine_gate_weight(wgpq)          # (3, H)
    wg_qp = _combine_gate_weight(wgqp)          # (3, H)
    gate_bias = jnp.concatenate([bgpq.reshape(1), bgqp.reshape(1)]
                                ).astype(jnp.float32)        # (2,) -> SMEM

    dmask3 = dmask_p.reshape(B, 1, Ld)
    qmask3 = qmask_p.reshape(B, 1, Lq)

    vmem_limit = _pick_vmem_limit()
    Bt = block_b if block_b is not None else _pick_block_b(B, Ld, Lq, H, vmem_limit)
    assert B % Bt == 0, "block_b must divide the batch size"

    if merge_fuse is None:
        merge_fuse = (H % 128 == 0)
    if transpose_scores is None:
        transpose_scores = (Ld * Lq >= H * H)

    # Grid-invariant operands are single-buffered (their index_maps are const).
    single = dict(pipeline_mode=pl.Buffered(1))

    grid_spec = pltpu.PrefetchScalarGridSpec(
        num_scalar_prefetch=0,
        grid=(B // Bt,),
        in_specs=[
            pl.BlockSpec((Bt, Ld, H), lambda b: (b, 0, 0)),             # u_doc
            pl.BlockSpec((Bt, Lq, H), lambda b: (b, 0, 0)),             # u_query
            pl.BlockSpec((Bt, 1, Ld), lambda b: (b, 0, 0)),             # doc_mask
            pl.BlockSpec((Bt, 1, Lq), lambda b: (b, 0, 0)),             # query_mask
            pl.BlockSpec((H, H), lambda b: (0, 0), **single),           # shared_weight
            pl.BlockSpec((3, H, H), lambda b: (0, 0, 0), **single),     # fuse_pq slabs
            pl.BlockSpec((1, H), lambda b: (0, 0), **single),           # b_fuse_pq
            pl.BlockSpec((3, H, H), lambda b: (0, 0, 0), **single),     # fuse_qp slabs
            pl.BlockSpec((1, H), lambda b: (0, 0), **single),           # b_fuse_qp
            pl.BlockSpec((3, H), lambda b: (0, 0), **single),           # gate_pq rows
            pl.BlockSpec((3, H), lambda b: (0, 0), **single),           # gate_qp rows
            pl.BlockSpec(memory_space=pltpu.MemorySpace.SMEM),          # gate biases
        ],
        out_specs=[
            pl.BlockSpec((Bt, Ld, H), lambda b: (b, 0, 0)),             # p_prime
            pl.BlockSpec((Bt, Lq, H), lambda b: (b, 0, 0)),             # q_prime
        ],
    )
    kernel = functools.partial(_co_attention_kernel, mm_dtype=matmul_dtype,
                               merge_fuse=merge_fuse,
                               transpose_scores=transpose_scores)
    p_prime, q_prime = pl.pallas_call(
        kernel,
        out_shape=(jax.ShapeDtypeStruct((B, Ld, H), u_doc.dtype),
                   jax.ShapeDtypeStruct((B, Lq, H), u_query.dtype)),
        grid_spec=grid_spec,
        compiler_params=pltpu.CompilerParams(
            dimension_semantics=("parallel",),
            vmem_limit_bytes=vmem_limit,
        ),
    )(u_doc_p, u_query_p, dmask3, qmask3,
      w, wf_pq, bfpq, wf_qp, bfqp, wg_pq, wg_qp, gate_bias)

    if Ld != Ld0:
        p_prime = p_prime[:, :Ld0, :]
    if Lq != Lq0:
        q_prime = q_prime[:, :Lq0, :]
    return p_prime, q_prime


def init_params(key, hidden_size):
    H = hidden_size
    k = jax.random.split(key, 9)
    xavier = (6.0 / (H + H)) ** 0.5
    lin_lim = 1.0 / (4 * H) ** 0.5
    w = jax.random.uniform(k[0], (H, H), jnp.float32, -xavier, xavier)
    # PyTorch Linear stores (out, in); fuse weights are pre-transposed to (in, out).
    wfpq = jax.random.uniform(k[1], (4 * H, H), jnp.float32, -lin_lim, lin_lim)
    bfpq = jax.random.uniform(k[2], (1, H), jnp.float32, -lin_lim, lin_lim)
    wfqp = jax.random.uniform(k[3], (4 * H, H), jnp.float32, -lin_lim, lin_lim)
    bfqp = jax.random.uniform(k[4], (1, H), jnp.float32, -lin_lim, lin_lim)
    wgpq = jax.random.uniform(k[5], (1, 4 * H), jnp.float32, -lin_lim, lin_lim)
    bgpq = jax.random.uniform(k[6], (1, 1), jnp.float32, -lin_lim, lin_lim)
    wgqp = jax.random.uniform(k[7], (1, 4 * H), jnp.float32, -lin_lim, lin_lim)
    bgqp = jax.random.uniform(k[8], (1, 1), jnp.float32, -lin_lim, lin_lim)
    return (w, wfpq, bfpq, wfqp, bfqp, wgpq, bgpq, wgqp, bgqp)


def reference(u_doc, u_query, doc_mask, query_mask, params):
    w, wfpq, bfpq, wfqp, bfqp, wgpq, bgpq, wgqp, bgqp = params
    uq_w = jax.nn.relu(u_query @ w)
    ud_w = jax.nn.relu(u_doc @ w)
    s = jnp.einsum('bqh,bdh->bqd', uq_w, ud_w)
    qm = query_mask[:, :, None]
    dm = doc_mask[:, None, :]
    s_p2q = jax.nn.softmax(qm * s + (1.0 - qm) * NEG_INF, axis=1)
    s_q2p = jax.nn.softmax(dm * s + (1.0 - dm) * NEG_INF, axis=2)
    q_tilde = jnp.einsum('bqd,bqh->bdh', s_p2q, u_query)
    p_tilde = jnp.einsum('bqd,bdh->bqh', s_q2p, u_doc)
    cat1 = jnp.concatenate([u_doc, q_tilde, u_doc * q_tilde, u_doc - q_tilde], 2)
    cat2 = jnp.concatenate([u_query, p_tilde, u_query * p_tilde, u_query - p_tilde], 2)
    fuse1 = jnp.tanh(cat1 @ wfpq + bfpq)
    fuse2 = jnp.tanh(cat2 @ wfqp + bfqp)
    gate1 = jax.nn.sigmoid(jnp.sum(cat1 * wgpq[None], -1, keepdims=True) + bgpq)
    gate2 = jax.nn.sigmoid(jnp.sum(cat2 * wgqp[None], -1, keepdims=True) + bgqp)
    p_prime = gate1 * fuse1 + (1.0 - gate1) * u_doc
    q_prime = gate2 * fuse2 + (1.0 - gate2) * u_query
    return p_prime, q_prime


if __name__ == "__main__":
    B, Ld, Lq, H = 2, 16, 8, 32
    key = jax.random.PRNGKey(0)
    k_doc, k_query, k_param = jax.random.split(key, 3)

    u_doc = jax.random.normal(k_doc, (B, Ld, H), jnp.float32)
    u_query = jax.random.normal(k_query, (B, Lq, H), jnp.float32)
    doc_lens = jnp.array([16, 12])
    query_lens = jnp.array([8, 5])
    doc_mask = (jnp.arange(Ld)[None, :] < doc_lens[:, None]).astype(jnp.float32)
    query_mask = (jnp.arange(Lq)[None, :] < query_lens[:, None]).astype(jnp.float32)

    params = init_params(k_param, H)

    p_prime, q_prime = co_attention(u_doc, u_query, doc_mask, query_mask, params)
    jax.block_until_ready((p_prime, q_prime))

    p_ref, q_ref = reference(u_doc, u_query, doc_mask, query_mask, params)
    assert jnp.allclose(p_prime, p_ref, rtol=2e-3, atol=2e-3), "p_prime mismatch"
    assert jnp.allclose(q_prime, q_ref, rtol=2e-3, atol=2e-3), "q_prime mismatch"
    print("KERNEL_OK")
</pallas_src>

<mosaic_0001>
module attributes {stable_mosaic.version = 11 : i64} {
  func.func @_co_attention_kernel(%arg0: i32, %arg1: memref<1x16x32xf32, #tpu.memory_space<vmem>>, %arg2: memref<1x8x32xf32, #tpu.memory_space<vmem>>, %arg3: memref<1x1x16xf32, #tpu.memory_space<vmem>>, %arg4: memref<1x1x8xf32, #tpu.memory_space<vmem>>, %arg5: memref<32x32xf32, #tpu.memory_space<vmem>>, %arg6: memref<3x32x32xf32, #tpu.memory_space<vmem>>, %arg7: memref<1x32xf32, #tpu.memory_space<vmem>>, %arg8: memref<3x32x32xf32, #tpu.memory_space<vmem>>, %arg9: memref<1x32xf32, #tpu.memory_space<vmem>>, %arg10: memref<3x32xf32, #tpu.memory_space<vmem>>, %arg11: memref<3x32xf32, #tpu.memory_space<vmem>>, %arg12: memref<2xf32, #tpu.memory_space<smem>>, %arg13: memref<1x16x32xf32, #tpu.memory_space<vmem>>, %arg14: memref<1x8x32xf32, #tpu.memory_space<vmem>>) attributes {dimension_semantics = [#tpu.dimension_semantics<parallel>], iteration_bounds = array<i64: 2>, scalar_prefetch = 0 : i64, scratch_operands = 0 : i64, tpu.core_type = #tpu.core_type<tc>, window_params = [{transform_indices = @transform_0, window_bounds = array<i64: 1, 16, 32>}, {transform_indices = @transform_1, window_bounds = array<i64: 1, 8, 32>}, {transform_indices = @transform_2, window_bounds = array<i64: 1, 1, 16>}, {transform_indices = @transform_3, window_bounds = array<i64: 1, 1, 8>}, {pipeline_mode = #tpu.pipeline_mode<synchronous>, transform_indices = @transform_4, window_bounds = array<i64: 32, 32>}, {pipeline_mode = #tpu.pipeline_mode<synchronous>, transform_indices = @transform_5, window_bounds = array<i64: 3, 32, 32>}, {pipeline_mode = #tpu.pipeline_mode<synchronous>, transform_indices = @transform_6, window_bounds = array<i64: 1, 32>}, {pipeline_mode = #tpu.pipeline_mode<synchronous>, transform_indices = @transform_7, window_bounds = array<i64: 3, 32, 32>}, {pipeline_mode = #tpu.pipeline_mode<synchronous>, transform_indices = @transform_8, window_bounds = array<i64: 1, 32>}, {pipeline_mode = #tpu.pipeline_mode<synchronous>, transform_indices = @transform_9, window_bounds = array<i64: 3, 32>}, {pipeline_mode = #tpu.pipeline_mode<synchronous>, transform_indices = @transform_10, window_bounds = array<i64: 3, 32>}, {transform_indices = @transform_11, window_bounds = array<i64: 2>}, {transform_indices = @transform_12, window_bounds = array<i64: 1, 16, 32>}, {transform_indices = @transform_13, window_bounds = array<i64: 1, 8, 32>}]} {
    %c0 = arith.constant 0 : index
    %c0_0 = arith.constant 0 : index
    %c0_1 = arith.constant 0 : index
    %0 = vector.load %arg1[%c0, %c0_0, %c0_1] : memref<1x16x32xf32, #tpu.memory_space<vmem>>, vector<1x16x32xf32>
    %c0_2 = arith.constant 0 : index
    %c0_3 = arith.constant 0 : index
    %c0_4 = arith.constant 0 : index
    %1 = vector.load %arg2[%c0_2, %c0_3, %c0_4] : memref<1x8x32xf32, #tpu.memory_space<vmem>>, vector<1x8x32xf32>
    %c0_5 = arith.constant 0 : index
    %c0_6 = arith.constant 0 : index
    %c0_7 = arith.constant 0 : index
    %2 = vector.load %arg3[%c0_5, %c0_6, %c0_7] : memref<1x1x16xf32, #tpu.memory_space<vmem>>, vector<1x1x16xf32>
    %c0_8 = arith.constant 0 : index
    %c0_9 = arith.constant 0 : index
    %c0_10 = arith.constant 0 : index
    %3 = vector.load %arg4[%c0_8, %c0_9, %c0_10] : memref<1x1x8xf32, #tpu.memory_space<vmem>>, vector<1x1x8xf32>
    %c0_11 = arith.constant 0 : index
    %c0_12 = arith.constant 0 : index
    %4 = vector.load %arg5[%c0_11, %c0_12] : memref<32x32xf32, #tpu.memory_space<vmem>>, vector<32x32xf32>
    %5 = vector.shape_cast %0 : vector<1x16x32xf32> to vector<16x32xf32>
    %6 = vector.shape_cast %1 : vector<1x8x32xf32> to vector<8x32xf32>
    %cst = arith.constant dense<0.000000e+00> : vector<16x32xf32>
    %7 = tpu.matmul %5, %4, %cst {dimension_numbers = #tpu.dot_dimension_numbers<[1], [0], [0], [1], [0, 0, 1, 1], [], []>} : vector<16x32xf32>, vector<32x32xf32>, vector<16x32xf32> -> vector<16x32xf32>
    %cst_13 = arith.constant 0.000000e+00 : f32
    %8 = vector.broadcast %cst_13 : f32 to vector<16x32xf32>
    %9 = arith.maximumf %7, %8 : vector<16x32xf32>
    %cst_14 = arith.constant dense<0.000000e+00> : vector<8x32xf32>
    %10 = tpu.matmul %6, %4, %cst_14 {dimension_numbers = #tpu.dot_dimension_numbers<[1], [0], [0], [1], [0, 0, 1, 1], [], []>} : vector<8x32xf32>, vector<32x32xf32>, vector<8x32xf32> -> vector<8x32xf32>
    %cst_15 = arith.constant 0.000000e+00 : f32
    %11 = vector.broadcast %cst_15 : f32 to vector<8x32xf32>
    %12 = arith.maximumf %10, %11 : vector<8x32xf32>
    %13 = vector.shape_cast %9 : vector<16x32xf32> to vector<1x16x32xf32>
    %14 = vector.shape_cast %12 : vector<8x32xf32> to vector<1x8x32xf32>
    "tpu.trace_start"() <{level = 10 : i32, message = "bdh,bqh->bdq"}> : () -> ()
    %cst_16 = arith.constant dense<0.000000e+00> : vector<1x16x8xf32>
    %15 = tpu.matmul %13, %14, %cst_16 {dimension_numbers = #tpu.dot_dimension_numbers<[2], [2], [1], [1], [0, 0, 0, 1, 1, 1], [0], [0]>} : vector<1x16x32xf32>, vector<1x8x32xf32>, vector<1x16x8xf32> -> vector<1x16x8xf32>
    "tpu.trace_stop"() : () -> ()
    "tpu.trace_start"() <{level = 10 : i32, message = "bqh,bdh->bqd"}> : () -> ()
    %cst_17 = arith.constant dense<0.000000e+00> : vector<1x8x16xf32>
    %16 = tpu.matmul %14, %13, %cst_17 {dimension_numbers = #tpu.dot_dimension_numbers<[2], [2], [1], [1], [0, 0, 0, 1, 1, 1], [0], [0]>} : vector<1x8x32xf32>, vector<1x16x32xf32>, vector<1x8x16xf32> -> vector<1x8x16xf32>
    %cst_18 = arith.constant 0.000000e+00 : f32
    "tpu.trace_stop"() : () -> ()
    %17 = vector.broadcast %cst_18 : f32 to vector<1x1x8xf32>
    %18 = arith.cmpf one, %3, %17 : vector<1x1x8xf32>
    %cst_19 = arith.constant -1.000000e+30 : f32
    %19 = vector.shape_cast %18 : vector<1x1x8xi1> to vector<1x1x8xi1>
    %20 = vector.broadcast %19 : vector<1x1x8xi1> to vector<1x16x8xi1>
    %21 = vector.broadcast %cst_19 : f32 to vector<1x16x8xf32>
    %22 = arith.select %20, %15, %21 : vector<1x16x8xi1>, vector<1x16x8xf32>
    %cst_20 = arith.constant dense<0xFF800000> : vector<1x16xf32>
    %23 = vector.multi_reduction <maximumf>, %22, %cst_20 [2] : vector<1x16x8xf32> to vector<1x16xf32>
    %24 = vector.shape_cast %23 : vector<1x16xf32> to vector<1x16x1xf32>
    %25 = vector.broadcast %24 : vector<1x16x1xf32> to vector<1x16x8xf32>
    %26 = arith.subf %22, %25 : vector<1x16x8xf32>
    %27 = math.exp %26 : vector<1x16x8xf32>
    %cst_21 = arith.constant dense<0.000000e+00> : vector<1x16xf32>
    %28 = vector.multi_reduction <add>, %27, %cst_21 [2] : vector<1x16x8xf32> to vector<1x16xf32>
    %29 = vector.shape_cast %28 : vector<1x16xf32> to vector<1x16x1xf32>
    %30 = tpu.reciprocal %29 {approx = true} : vector<1x16x1xf32> -> vector<1x16x1xf32>
    %31 = vector.broadcast %30 : vector<1x16x1xf32> to vector<1x16x8xf32>
    %32 = arith.mulf %27, %31 : vector<1x16x8xf32>
    %cst_22 = arith.constant 0.000000e+00 : f32
    %33 = vector.broadcast %cst_22 : f32 to vector<1x1x16xf32>
    %34 = arith.cmpf one, %2, %33 : vector<1x1x16xf32>
    %cst_23 = arith.constant -1.000000e+30 : f32
    %35 = vector.shape_cast %34 : vector<1x1x16xi1> to vector<1x1x16xi1>
    %36 = vector.broadcast %35 : vector<1x1x16xi1> to vector<1x8x16xi1>
    %37 = vector.broadcast %cst_23 : f32 to vector<1x8x16xf32>
    %38 = arith.select %36, %16, %37 : vector<1x8x16xi1>, vector<1x8x16xf32>
    %cst_24 = arith.constant dense<0xFF800000> : vector<1x8xf32>
    %39 = vector.multi_reduction <maximumf>, %38, %cst_24 [2] : vector<1x8x16xf32> to vector<1x8xf32>
    %40 = vector.shape_cast %39 : vector<1x8xf32> to vector<1x8x1xf32>
    %41 = vector.broadcast %40 : vector<1x8x1xf32> to vector<1x8x16xf32>
    %42 = arith.subf %38, %41 : vector<1x8x16xf32>
    %43 = math.exp %42 : vector<1x8x16xf32>
    %cst_25 = arith.constant dense<0.000000e+00> : vector<1x8xf32>
    %44 = vector.multi_reduction <add>, %43, %cst_25 [2] : vector<1x8x16xf32> to vector<1x8xf32>
    %45 = vector.shape_cast %44 : vector<1x8xf32> to vector<1x8x1xf32>
    %46 = tpu.reciprocal %45 {approx = true} : vector<1x8x1xf32> -> vector<1x8x1xf32>
    %47 = vector.broadcast %46 : vector<1x8x1xf32> to vector<1x8x16xf32>
    %48 = arith.mulf %43, %47 : vector<1x8x16xf32>
    "tpu.trace_start"() <{level = 10 : i32, message = "bdq,bqh->bdh"}> : () -> ()
    %cst_26 = arith.constant dense<0.000000e+00> : vector<1x16x32xf32>
    %49 = tpu.matmul %32, %1, %cst_26 {dimension_numbers = #tpu.dot_dimension_numbers<[2], [1], [1], [2], [0, 0, 0, 1, 1, 2], [0], [0]>} : vector<1x16x8xf32>, vector<1x8x32xf32>, vector<1x16x32xf32> -> vector<1x16x32xf32>
    "tpu.trace_stop"() : () -> ()
    "tpu.trace_start"() <{level = 10 : i32, message = "bqd,bdh->bqh"}> : () -> ()
    %cst_27 = arith.constant dense<0.000000e+00> : vector<1x8x32xf32>
    %50 = tpu.matmul %48, %0, %cst_27 {dimension_numbers = #tpu.dot_dimension_numbers<[2], [1], [1], [2], [0, 0, 0, 1, 1, 2], [0], [0]>} : vector<1x8x16xf32>, vector<1x16x32xf32>, vector<1x8x32xf32> -> vector<1x8x32xf32>
    "tpu.trace_stop"() : () -> ()
    %51 = vector.shape_cast %49 : vector<1x16x32xf32> to vector<16x32xf32>
    %52 = vector.shape_cast %50 : vector<1x8x32xf32> to vector<8x32xf32>
    %c0_28 = arith.constant 0 : index
    %53 = memref.load %arg12[%c0_28] : memref<2xf32, #tpu.memory_space<smem>>
    %54 = arith.mulf %5, %51 : vector<16x32xf32>
    %c0_29 = arith.constant 0 : index
    %c0_30 = arith.constant 0 : index
    %c0_31 = arith.constant 0 : index
    %55 = vector.load %arg6[%c0_29, %c0_30, %c0_31] : memref<3x32x32xf32, #tpu.memory_space<vmem>>, vector<1x32x32xf32>
    %56 = vector.shape_cast %55 : vector<1x32x32xf32> to vector<32x32xf32>
    %cst_32 = arith.constant dense<0.000000e+00> : vector<16x32xf32>
    %57 = tpu.matmul %5, %56, %cst_32 {dimension_numbers = #tpu.dot_dimension_numbers<[1], [0], [0], [1], [0, 0, 1, 1], [], []>} : vector<16x32xf32>, vector<32x32xf32>, vector<16x32xf32> -> vector<16x32xf32>
    %c1 = arith.constant 1 : index
    %c0_33 = arith.constant 0 : index
    %c0_34 = arith.constant 0 : index
    %58 = vector.load %arg6[%c1, %c0_33, %c0_34] : memref<3x32x32xf32, #tpu.memory_space<vmem>>, vector<1x32x32xf32>
    %59 = vector.shape_cast %58 : vector<1x32x32xf32> to vector<32x32xf32>
    %cst_35 = arith.constant dense<0.000000e+00> : vector<16x32xf32>
    %60 = tpu.matmul %51, %59, %cst_35 {dimension_numbers = #tpu.dot_dimension_numbers<[1], [0], [0], [1], [0, 0, 1, 1], [], []>} : vector<16x32xf32>, vector<32x32xf32>, vector<16x32xf32> -> vector<16x32xf32>
    %61 = arith.addf %57, %60 : vector<16x32xf32>
    %c2 = arith.constant 2 : index
    %c0_36 = arith.constant 0 : index
    %c0_37 = arith.constant 0 : index
    %62 = vector.load %arg6[%c2, %c0_36, %c0_37] : memref<3x32x32xf32, #tpu.memory_space<vmem>>, vector<1x32x32xf32>
    %63 = vector.shape_cast %62 : vector<1x32x32xf32> to vector<32x32xf32>
    %cst_38 = arith.constant dense<0.000000e+00> : vector<16x32xf32>
    %64 = tpu.matmul %54, %63, %cst_38 {dimension_numbers = #tpu.dot_dimension_numbers<[1], [0], [0], [1], [0, 0, 1, 1], [], []>} : vector<16x32xf32>, vector<32x32xf32>, vector<16x32xf32> -> vector<16x32xf32>
    %65 = arith.addf %61, %64 : vector<16x32xf32>
    %c0_39 = arith.constant 0 : index
    %c0_40 = arith.constant 0 : index
    %66 = vector.load %arg7[%c0_39, %c0_40] : memref<1x32xf32, #tpu.memory_space<vmem>>, vector<1x32xf32>
    %67 = vector.broadcast %66 : vector<1x32xf32> to vector<16x32xf32>
    %68 = arith.addf %65, %67 : vector<16x32xf32>
    %69 = math.tanh %68 : vector<16x32xf32>
    %c0_41 = arith.constant 0 : index
    %c0_42 = arith.constant 0 : index
    %70 = vector.load %arg10[%c0_41, %c0_42] : memref<3x32xf32, #tpu.memory_space<vmem>>, vector<3x32xf32>
    %71 = vector.extract_strided_slice %70 {offsets = [0, 0], sizes = [1, 32], strides = [1, 1]} : vector<3x32xf32> to vector<1x32xf32>
    %72 = vector.broadcast %71 : vector<1x32xf32> to vector<16x32xf32>
    %73 = arith.mulf %5, %72 : vector<16x32xf32>
    %74 = vector.extract_strided_slice %70 {offsets = [1, 0], sizes = [1, 32], strides = [1, 1]} : vector<3x32xf32> to vector<1x32xf32>
    %75 = vector.broadcast %74 : vector<1x32xf32> to vector<16x32xf32>
    %76 = arith.mulf %51, %75 : vector<16x32xf32>
    %77 = arith.addf %73, %76 : vector<16x32xf32>
    %78 = vector.extract_strided_slice %70 {offsets = [2, 0], sizes = [1, 32], strides = [1, 1]} : vector<3x32xf32> to vector<1x32xf32>
    %79 = vector.broadcast %78 : vector<1x32xf32> to vector<16x32xf32>
    %80 = arith.mulf %54, %79 : vector<16x32xf32>
    %81 = arith.addf %77, %80 : vector<16x32xf32>
    %cst_43 = arith.constant dense<0.000000e+00> : vector<16xf32>
    %82 = vector.multi_reduction <add>, %81, %cst_43 [1] : vector<16x32xf32> to vector<16xf32>
    %83 = vector.shape_cast %82 : vector<16xf32> to vector<16x1xf32>
    %84 = vector.broadcast %53 : f32 to vector<16x1xf32>
    %85 = arith.addf %83, %84 : vector<16x1xf32>
    %86 = arith.negf %85 : vector<16x1xf32>
    %87 = math.exp %86 : vector<16x1xf32>
    %cst_44 = arith.constant 1.000000e+00 : f32
    %88 = vector.broadcast %cst_44 : f32 to vector<16x1xf32>
    %89 = arith.addf %88, %87 : vector<16x1xf32>
    %90 = arith.divf %88, %89 : vector<16x1xf32>
    %91 = vector.broadcast %90 : vector<16x1xf32> to vector<16x32xf32>
    %92 = arith.mulf %91, %69 : vector<16x32xf32>
    %cst_45 = arith.constant 1.000000e+00 : f32
    %93 = vector.broadcast %cst_45 : f32 to vector<16x1xf32>
    %94 = arith.subf %93, %90 : vector<16x1xf32>
    %95 = vector.broadcast %94 : vector<16x1xf32> to vector<16x32xf32>
    %96 = arith.mulf %95, %5 : vector<16x32xf32>
    %97 = arith.addf %92, %96 : vector<16x32xf32>
    %c1_46 = arith.constant 1 : index
    %98 = memref.load %arg12[%c1_46] : memref<2xf32, #tpu.memory_space<smem>>
    %99 = arith.mulf %6, %52 : vector<8x32xf32>
    %c0_47 = arith.constant 0 : index
    %c0_48 = arith.constant 0 : index
    %c0_49 = arith.constant 0 : index
    %100 = vector.load %arg8[%c0_47, %c0_48, %c0_49] : memref<3x32x32xf32, #tpu.memory_space<vmem>>, vector<1x32x32xf32>
    %101 = vector.shape_cast %100 : vector<1x32x32xf32> to vector<32x32xf32>
    %cst_50 = arith.constant dense<0.000000e+00> : vector<8x32xf32>
    %102 = tpu.matmul %6, %101, %cst_50 {dimension_numbers = #tpu.dot_dimension_numbers<[1], [0], [0], [1], [0, 0, 1, 1], [], []>} : vector<8x32xf32>, vector<32x32xf32>, vector<8x32xf32> -> vector<8x32xf32>
    %c1_51 = arith.constant 1 : index
    %c0_52 = arith.constant 0 : index
    %c0_53 = arith.constant 0 : index
    %103 = vector.load %arg8[%c1_51, %c0_52, %c0_53] : memref<3x32x32xf32, #tpu.memory_space<vmem>>, vector<1x32x32xf32>
    %104 = vector.shape_cast %103 : vector<1x32x32xf32> to vector<32x32xf32>
    %cst_54 = arith.constant dense<0.000000e+00> : vector<8x32xf32>
    %105 = tpu.matmul %52, %104, %cst_54 {dimension_numbers = #tpu.dot_dimension_numbers<[1], [0], [0], [1], [0, 0, 1, 1], [], []>} : vector<8x32xf32>, vector<32x32xf32>, vector<8x32xf32> -> vector<8x32xf32>
    %106 = arith.addf %102, %105 : vector<8x32xf32>
    %c2_55 = arith.constant 2 : index
    %c0_56 = arith.constant 0 : index
    %c0_57 = arith.constant 0 : index
    %107 = vector.load %arg8[%c2_55, %c0_56, %c0_57] : memref<3x32x32xf32, #tpu.memory_space<vmem>>, vector<1x32x32xf32>
    %108 = vector.shape_cast %107 : vector<1x32x32xf32> to vector<32x32xf32>
    %cst_58 = arith.constant dense<0.000000e+00> : vector<8x32xf32>
    %109 = tpu.matmul %99, %108, %cst_58 {dimension_numbers = #tpu.dot_dimension_numbers<[1], [0], [0], [1], [0, 0, 1, 1], [], []>} : vector<8x32xf32>, vector<32x32xf32>, vector<8x32xf32> -> vector<8x32xf32>
    %110 = arith.addf %106, %109 : vector<8x32xf32>
    %c0_59 = arith.constant 0 : index
    %c0_60 = arith.constant 0 : index
    %111 = vector.load %arg9[%c0_59, %c0_60] : memref<1x32xf32, #tpu.memory_space<vmem>>, vector<1x32xf32>
    %112 = vector.broadcast %111 : vector<1x32xf32> to vector<8x32xf32>
    %113 = arith.addf %110, %112 : vector<8x32xf32>
    %114 = math.tanh %113 : vector<8x32xf32>
    %c0_61 = arith.constant 0 : index
    %c0_62 = arith.constant 0 : index
    %115 = vector.load %arg11[%c0_61, %c0_62] : memref<3x32xf32, #tpu.memory_space<vmem>>, vector<3x32xf32>
    %116 = vector.extract_strided_slice %115 {offsets = [0, 0], sizes = [1, 32], strides = [1, 1]} : vector<3x32xf32> to vector<1x32xf32>
    %117 = vector.broadcast %116 : vector<1x32xf32> to vector<8x32xf32>
    %118 = arith.mulf %6, %117 : vector<8x32xf32>
    %119 = vector.extract_strided_slice %115 {offsets = [1, 0], sizes = [1, 32], strides = [1, 1]} : vector<3x32xf32> to vector<1x32xf32>
    %120 = vector.broadcast %119 : vector<1x32xf32> to vector<8x32xf32>
    %121 = arith.mulf %52, %120 : vector<8x32xf32>
    %122 = arith.addf %118, %121 : vector<8x32xf32>
    %123 = vector.extract_strided_slice %115 {offsets = [2, 0], sizes = [1, 32], strides = [1, 1]} : vector<3x32xf32> to vector<1x32xf32>
    %124 = vector.broadcast %123 : vector<1x32xf32> to vector<8x32xf32>
    %125 = arith.mulf %99, %124 : vector<8x32xf32>
    %126 = arith.addf %122, %125 : vector<8x32xf32>
    %cst_63 = arith.constant dense<0.000000e+00> : vector<8xf32>
    %127 = vector.multi_reduction <add>, %126, %cst_63 [1] : vector<8x32xf32> to vector<8xf32>
    %128 = vector.shape_cast %127 : vector<8xf32> to vector<8x1xf32>
    %129 = vector.broadcast %98 : f32 to vector<8x1xf32>
    %130 = arith.addf %128, %129 : vector<8x1xf32>
    %131 = arith.negf %130 : vector<8x1xf32>
    %132 = math.exp %131 : vector<8x1xf32>
    %cst_64 = arith.constant 1.000000e+00 : f32
    %133 = vector.broadcast %cst_64 : f32 to vector<8x1xf32>
    %134 = arith.addf %133, %132 : vector<8x1xf32>
    %135 = arith.divf %133, %134 : vector<8x1xf32>
    %136 = vector.broadcast %135 : vector<8x1xf32> to vector<8x32xf32>
    %137 = arith.mulf %136, %114 : vector<8x32xf32>
    %cst_65 = arith.constant 1.000000e+00 : f32
    %138 = vector.broadcast %cst_65 : f32 to vector<8x1xf32>
    %139 = arith.subf %138, %135 : vector<8x1xf32>
    %140 = vector.broadcast %139 : vector<8x1xf32> to vector<8x32xf32>
    %141 = arith.mulf %140, %6 : vector<8x32xf32>
    %142 = arith.addf %137, %141 : vector<8x32xf32>
    %143 = vector.shape_cast %97 : vector<16x32xf32> to vector<1x16x32xf32>
    %c0_66 = arith.constant 0 : index
    %c0_67 = arith.constant 0 : index
    %c0_68 = arith.constant 0 : index
    %144 = vector.load %arg13[%c0_66, %c0_67, %c0_68] : memref<1x16x32xf32, #tpu.memory_space<vmem>>, vector<1x16x32xf32>
    tpu.vector_store %arg13[%c0_66, %c0_67, %c0_68], %143 {strides = array<i32>} : memref<1x16x32xf32, #tpu.memory_space<vmem>>, vector<1x16x32xf32>,
    %145 = vector.shape_cast %142 : vector<8x32xf32> to vector<1x8x32xf32>
    %c0_69 = arith.constant 0 : index
    %c0_70 = arith.constant 0 : index
    %c0_71 = arith.constant 0 : index
    %146 = vector.load %arg14[%c0_69, %c0_70, %c0_71] : memref<1x8x32xf32, #tpu.memory_space<vmem>>, vector<1x8x32xf32>
    tpu.vector_store %arg14[%c0_69, %c0_70, %c0_71], %145 {strides = array<i32>} : memref<1x8x32xf32, #tpu.memory_space<vmem>>, vector<1x8x32xf32>,
    return
  }
  func.func @transform_0(%arg0: i32) -> (i32, i32, i32) {
    %c0_i32 = arith.constant 0 : i32
    %c0_i32_0 = arith.constant 0 : i32
    %c0_i32_1 = arith.constant 0 : i32
    return %arg0, %c0_i32, %c0_i32_0 : i32, i32, i32
  }
  func.func @transform_1(%arg0: i32) -> (i32, i32, i32) {
    %c0_i32 = arith.constant 0 : i32
    %c0_i32_0 = arith.constant 0 : i32
    %c0_i32_1 = arith.constant 0 : i32
    return %arg0, %c0_i32, %c0_i32_0 : i32, i32, i32
  }
  func.func @transform_2(%arg0: i32) -> (i32, i32, i32) {
    %c0_i32 = arith.constant 0 : i32
    %c0_i32_0 = arith.constant 0 : i32
    %c0_i32_1 = arith.constant 0 : i32
    return %arg0, %c0_i32, %c0_i32_0 : i32, i32, i32
  }
  func.func @transform_3(%arg0: i32) -> (i32, i32, i32) {
    %c0_i32 = arith.constant 0 : i32
    %c0_i32_0 = arith.constant 0 : i32
    %c0_i32_1 = arith.constant 0 : i32
    return %arg0, %c0_i32, %c0_i32_0 : i32, i32, i32
  }
  func.func @transform_4(%arg0: i32) -> (i32, i32) {
    %c0_i32 = arith.constant 0 : i32
    %c0_i32_0 = arith.constant 0 : i32
    %c0_i32_1 = arith.constant 0 : i32
    return %c0_i32, %c0_i32_0 : i32, i32
  }
  func.func @transform_5(%arg0: i32) -> (i32, i32, i32) {
    %c0_i32 = arith.constant 0 : i32
    %c0_i32_0 = arith.constant 0 : i32
    %c0_i32_1 = arith.constant 0 : i32
    %c0_i32_2 = arith.constant 0 : i32
    return %c0_i32, %c0_i32_0, %c0_i32_1 : i32, i32, i32
  }
  func.func @transform_6(%arg0: i32) -> (i32, i32) {
    %c0_i32 = arith.constant 0 : i32
    %c0_i32_0 = arith.constant 0 : i32
    %c0_i32_1 = arith.constant 0 : i32
    return %c0_i32, %c0_i32_0 : i32, i32
  }
  func.func @transform_7(%arg0: i32) -> (i32, i32, i32) {
    %c0_i32 = arith.constant 0 : i32
    %c0_i32_0 = arith.constant 0 : i32
    %c0_i32_1 = arith.constant 0 : i32
    %c0_i32_2 = arith.constant 0 : i32
    return %c0_i32, %c0_i32_0, %c0_i32_1 : i32, i32, i32
  }
  func.func @transform_8(%arg0: i32) -> (i32, i32) {
    %c0_i32 = arith.constant 0 : i32
    %c0_i32_0 = arith.constant 0 : i32
    %c0_i32_1 = arith.constant 0 : i32
    return %c0_i32, %c0_i32_0 : i32, i32
  }
  func.func @transform_9(%arg0: i32) -> (i32, i32) {
    %c0_i32 = arith.constant 0 : i32
    %c0_i32_0 = arith.constant 0 : i32
    %c0_i32_1 = arith.constant 0 : i32
    return %c0_i32, %c0_i32_0 : i32, i32
  }
  func.func @transform_10(%arg0: i32) -> (i32, i32) {
    %c0_i32 = arith.constant 0 : i32
    %c0_i32_0 = arith.constant 0 : i32
    %c0_i32_1 = arith.constant 0 : i32
    return %c0_i32, %c0_i32_0 : i32, i32
  }
  func.func @transform_11(%arg0: i32) -> i32 {
    %c0_i32 = arith.constant 0 : i32
    %c0_i32_0 = arith.constant 0 : i32
    return %c0_i32 : i32
  }
  func.func @transform_12(%arg0: i32) -> (i32, i32, i32) {
    %c0_i32 = arith.constant 0 : i32
    %c0_i32_0 = arith.constant 0 : i32
    %c0_i32_1 = arith.constant 0 : i32
    return %arg0, %c0_i32, %c0_i32_0 : i32, i32, i32
  }
  func.func @transform_13(%arg0: i32) -> (i32, i32, i32) {
    %c0_i32 = arith.constant 0 : i32
    %c0_i32_0 = arith.constant 0 : i32
    %c0_i32_1 = arith.constant 0 : i32
    return %arg0, %c0_i32, %c0_i32_0 : i32, i32, i32
  }
}

</mosaic_0001>

<bundles_post_ra>
// kernel: tpu_custom_call.1
= control target key start
LH: loop header
LB: loop body
LE: loop exit
PB: predicated region body
PF: predicated region fallthrough
CT: control target
= control target key end

     0   :  { %s3279_s0 = inlined_call_operand.hbm [shape: f32[2,16,32], index: 0, kind: input, shape index: {}]   ;;  %s3280_s1 = inlined_call_operand.hbm [shape: f32[2,8,32], index: 1, kind: input, shape index: {}]   ;;  %s3281_s2 = inlined_call_operand.vmem [shape: f32[2,1,16], index: 2, kind: input, shape index: {}]   ;;  %s3282_s3 = inlined_call_operand.hbm [shape: f32[2,1,8], index: 3, kind: input, shape index: {}]   ;;  %s3283_s4 = inlined_call_operand.hbm [shape: f32[32,32], index: 4, kind: input, shape index: {}]   ;;  %s3284_s5 = inlined_call_operand.hbm [shape: f32[3,32,32], index: 5, kind: input, shape index: {}]   ;;  %s3285_s6 = inlined_call_operand.vmem [shape: f32[1,32], index: 6, kind: input, shape index: {}]   ;;  %s3286_s7 = inlined_call_operand.hbm [shape: f32[3,32,32], index: 7, kind: input, shape index: {}]   ;;  %s3287_s8 = inlined_call_operand.vmem [shape: f32[1,32], index: 8, kind: input, shape index: {}]   ;;  %s3288_s9 = inlined_call_operand.vmem [shape: f32[3,32], index: 9, kind: input, shape index: {}]   ;;  %s3289_s10 = inlined_call_operand.vmem [shape: f32[3,32], index: 10, kind: input, shape index: {}]   ;;  %s3290_s11 = inlined_call_operand.vmem [shape: f32[2], index: 11, kind: input, shape index: {}]   ;;  %s3291_s12 = inlined_call_operand.hbm [shape: f32[2,16,32], index: 12, kind: output, shape index: {0}]   ;;  %s3292_s13 = inlined_call_operand.hbm [shape: f32[2,8,32], index: 13, kind: output, shape index: {1}]  }
   0x1   :  { %3318 = sst [smem:[#allocation31_spill]] %s3280_s1 }
   0x2   :  { %3319 = sst [smem:[#allocation32_spill]] %s3281_s2 }
   0x3   :  { %3320 = sst [smem:[#allocation33_spill]] %s3283_s4 }
   0x4   :  { %3321 = sst [smem:[#allocation34_spill]] %s3285_s6 }
   0x5   :  { %3322 = sst [smem:[#allocation35_spill]] %s3287_s8 }
   0x6   :  { %3323 = sst [smem:[#allocation36_spill]] %s3288_s9 }
   0x7   :  { %3324 = sst [smem:[#allocation37_spill]] %s3289_s10 }
   0x8   :  { %3325 = sst [smem:[#allocation38_spill]] %s3291_s12 }
   0x9   :  { %3326 = sst [smem:[#allocation39_spill]] %s3292_s13 }
   0xa   :  { %19 = vsyncpa [#allocation3], 0 }
   0xb   :  { %21 = vsyncpa [#allocation3 + $0x1], 0 }
   0xc   :  { %22 = vsyncpa [#allocation7], 0 }
   0xd   :  { %24 = vsyncpa [#allocation7 + $0x1], 0 }
   0xe   :  { %25 = vsyncpa [#allocation10], 0 }
   0xf   :  { %26 = vsyncpa [#allocation13], 0 }
  0x10   :  { %27 = vsyncpa [#allocation5], 0 }
  0x11   :  { %28 = vsyncpa [#allocation4], 0 }
  0x12   :  { %30 = vsyncpa [#allocation4 + $0x1], 0 }
  0x13   :  { %31 = vsyncpa [#allocation17], 0 }
  0x14   :  { %33 = vsyncpa [#allocation17 + $0x1], 0  ;;  %s2786_s25 = smov 0   ;;  %s2788_s26 = smov 0  }
  0x15   :  { %s2790_s27 = smov 0   ;;  %s2792_s28 = smov 0  }
  0x16 LB: > { %3327 = sst [smem:[#allocation25_spill]] %s2685_s25  ;;  %s2699_s29 = smov [#allocation9]   ;;  %s2697_s28 = sphi %s2792_s28, %s3373_s28   ;;  %s2693_s27 = sphi %s2790_s27, %s3375_s27   ;;  %s2689_s26 = sphi %s2788_s26, %s3377_s26   ;;  %s2685_s25 = sphi %s2786_s25, %s3376_s25  }
  0x17   : > { %3328 = sst [smem:[#allocation26_spill]] %s2693_s27  ;;  %s380_s30 = sshll.u32 %s2699_s29, 4  ;;  %s381_s30 = int_to_ptr.vmem [resolvable:$true] %s380_s30 }
  0x18   : > { %s2807_s14 = sadd.s32 4294967295, %s2697_s28   ;;  %p1962_p0 = scmp.ge.s32.totalorder %s2697_s28, 1 }
  0x19   : > { %p3293_p1 = scmp.eq.s32.totalorder %s2807_s14, 0  ;;  %p368_p2 = scmp.lt.s32.totalorder %s2697_s28, 3 }
  0x1a   : > { %s3331_s4 = sld [smem:[#allocation33_spill]] }
  0x1b   : > { %p2812_p3 = pnand %p1962_p0, %p368_p2 }
  0x1d   : > { %s3329_s15 = scalar_select %p2812_p3, 1, 0 }
  0x1e   : > { %p2280_p5 = pneg %p2812_p3 }
  0x20   : > { %p2821_p6 = pnand %p2280_p5, %p3293_p1  ;;  %s2394_s20 = scalar_lea.hbm %s3331_s4, 512 }
  0x21   : > { %p2395_p7 = scmp.ne.s32.totalorder %s3331_s4, %s2394_s20  ;;  %p2401_p11 = scmp.lt.u32.totalorder %s2394_s20, %s3331_s4 }
  0x22   : > { %s3330_s16 = scalar_select %p2821_p6, 1, 0 }
  0x23   : > { %p2834_p8 = pneg %p2821_p6 }
  0x25   : > { %s3332_s23 = scalar_select %p2834_p8, 1, 0 }
  0x26   : > { %p2397_p9 = pnand %p2834_p8, %p2395_p7 }
  0x28   : > { %p2398_p10 = pneg %p2397_p9 }
  0x2a   : > { %p2403_p12 = pnand %p2401_p11, %p2398_p10 }
  0x2c   : > { %2406 = shalt.err (!%p2403_p12)
}
  0x2d   : > { %s2407_s18 = scalar_lea.vmem %s381_s30, 512  ;;  %p2415_p5 = scmp.lt.s32.totalorder %s381_s30, %s381_s30 }
  0x2e   : > { %p2408_p13 = scmp.ne.s32.totalorder %s381_s30, %s2407_s18  ;;  %p2416_p4 = scmp.lt.s32.totalorder %s2407_s18, %s2407_s18 }
  0x30   : > { %p2410_p0 = pnand %p2408_p13, %p2834_p8  ;;  %p2417_p1 = por %p2416_p4, %p2415_p5 }
  0x32   : > { %p2411_p2 = pneg %p2410_p0 }
  0x34   : > { %p2418_p3 = pnand %p2417_p1, %p2411_p2 }
  0x36   : > { %2421 = shalt.err (!%p2418_p3)
}
  0x37   : > { %s3295_s19 = smov 128   ;;  %s3297_s20 = smov 8  }
  0x38   : > { %2283 = dma.hbm_to_vmem [thread:$0]  (!%p2821_p6), %s3331_s4, 512, %s381_s30, [#allocation10], %s3295_s19, %s3295_s19, %s3297_s20  }
  0x39   : > { %s2854_s24 = sadd.s32 1, %s2697_s28   ;;  %s46_s29 = sadd.s32 1, %s2693_s27 }
  0x3a   : > { %3333 = sst [smem:[#allocation27_spill]] %s2854_s24  ;;  %s43_s18 = ssub.s32 %s2697_s28, %s2854_s24 }
  0x3b   : > { %p53_p1 = scmp.ne.s32.totalorder %s2693_s27, %s2689_s26  ;;  %p44_p3 = scmp.eq.s32.totalorder %s43_s18, 0 }
  0x3c   : > { %p54_p4 = scmp.eq.s32.totalorder %s2697_s28, 0  ;;  %p59_p7 = scmp.ne.s32.totalorder %s2689_s26, %s2685_s25 }
  0x3d   : > { %p329_p9 = scmp.eq.s32.totalorder %s2807_s14, 1  ;;  %p3335_p11 = scmp.eq.s32.totalorder %s2807_s14, 0 }
  0x3e   : > { %s2866_s17 = scalar_select %p44_p3, %s2693_s27, %s46_s29  }
  0x3f   : > { %p55_p10 = por %p54_p4, %p53_p1  ;;  %p2870_p12 = por %p3335_p11, %p59_p7 }
  0x40   : > { %3334 = sst [smem:[#allocation28_spill]] %s2866_s17  ;;  %p2874_p13 = por %p329_p9, %p53_p1 }
  0x41   : > { %s3336_s21 = scalar_select %p2870_p12, 1, 0 }
  0x42   : > { %s3337_s30 = scalar_select %p2874_p13, 1, 0 }
  0x43   : > { %s3339_s22 = sadd.s32 4294967294, %s2697_s28   ;;  %p2314_p2 = scmp.lt.s32.totalorder %s2697_s28, 2 }
  0x44   : > { %3338 = sst [smem:[#allocation29_spill]] %s3337_s30  ;;  %p335_p0 = scmp.eq.s32.totalorder %s3339_s22, 1 }
  0x45   : > { %s2882_s19 = sand.u32 1, %s2693_s27   ;;  %s464_s29 = sand.u32 1, %s2697_s28  }
  0x46   : > { %p2884_p5 = por %p335_p0, %p59_p7  ;;  %p2889_p3 = pnand %p2314_p2, %p55_p10 }
  0x47   : > { %s1971_s4 = sshll.u32 %s2882_s19, 3  ;;  %s1972_s17 = sshll.u32 %s2697_s28, 7 }
  0x48   : > { %s3340_s18 = scalar_select %p2884_p5, 1, 0 }
  0x49   : > { %s3342_s20 = scalar_select %p2889_p3, 1, 0 }
  0x4a   : > { %3341 = sst [smem:[#allocation30_spill]] %s3340_s18  ;;  %s3343_s1 = sld [smem:[#allocation31_spill]] }
  0x4b   : > { %s468_s27 = scalar_lea.vmem [#allocation6], %s1971_s4  ;;  %s2902_s18 = scalar_lea.sflag [#allocation7], %s464_s29 }
  0x4c   : > { %s475_s13 = sshll.u32 %s468_s27, 4  ;;  %p2908_p4 = pneg %p2889_p3  ;;  %s2900_s13 = int_to_ptr.vmem [resolvable:$true] %s475_s13 }
  0x4e   : > { %s3344_s12 = scalar_select %p2908_p4, 1, 0 }
  0x50   : > { %s2898_s22 = scalar_lea.hbm %s3343_s1, %s1972_s17  ;;  %s2427_s4 = scalar_lea.hbm %s3343_s1, 256 }
  0x51   : > { %s2422_s30 = scalar_lea.hbm %s2898_s22, 128  ;;  %p2428_p10 = scmp.lt.u32.totalorder %s2898_s22, %s3343_s1 }
  0x52   : > { %p2423_p1 = scmp.ne.s32.totalorder %s2898_s22, %s2422_s30  ;;  %p2429_p11 = scmp.lt.u32.totalorder %s2427_s4, %s2422_s30 }
  0x53   : > { %p2431_p2 = scmp.lt.u32.totalorder %s2422_s30, %s2898_s22 }
  0x54   : > { %p2425_p7 = pnand %p2908_p4, %p2423_p1  ;;  %p2430_p0 = por %p2429_p11, %p2428_p10 }
  0x56   : > { %p2426_p9 = pneg %p2425_p7  ;;  %p2432_p5 = por %p2431_p2, %p2430_p0 }
  0x58   : > { %p2433_p13 = pnand %p2432_p5, %p2426_p9 }
  0x5a   : > { %2436 = shalt.err (!%p2433_p13)
}
  0x5b   : > { %s2437_s29 = scalar_lea.vmem %s2900_s13, 128  ;;  %s2702_s25 = smov [#allocation6]  }
  0x5c   : > { %p2438_p1 = scmp.ne.s32.totalorder %s2900_s13, %s2437_s29  ;;  %s2442_s17 = sshll.u32 %s2702_s25, 4  ;;  %s2443_s17 = int_to_ptr.vmem [resolvable:$false] %s2442_s17 }
  0x5d   : > { %s2444_s27 = scalar_lea.vmem %s2443_s17, 256  ;;  %p2445_p6 = scmp.lt.s32.totalorder %s2900_s13, %s2443_s17 }
  0x5e   : > { %p2440_p7 = pnand %p2438_p1, %p2908_p4  ;;  %p2446_p8 = scmp.lt.s32.totalorder %s2444_s27, %s2437_s29 }
  0x60   : > { %p2441_p12 = pneg %p2440_p7  ;;  %p2447_p10 = por %p2446_p8, %p2445_p6 }
  0x62   : > { %p2448_p11 = pnand %p2447_p10, %p2441_p12 }
  0x64   : > { %2451 = shalt.err (!%p2448_p11)
}
  0x65   : > { %2299 = dma.hbm_to_vmem [thread:$0]  (!%p2889_p3), %s2898_s22, 128, %s2900_s13, %s2902_s18  }
  0x66   : > { %s2703_s30 = smov [#allocation11]   ;;  %s2704_s24 = smov [#allocation12]  }
  0x67   : > { %s393_s4 = sshll.u32 %s2703_s30, 4  ;;  %s409_s1 = sshll.u32 %s2704_s24, 4  ;;  %s394_s4 = int_to_ptr.vmem [resolvable:$true] %s393_s4  ;;  %s410_s1 = int_to_ptr.vmem [resolvable:$true] %s409_s1 }
  0x68   : > { %s2452_s17 = scalar_lea.hbm %s3284_s5, 1536  ;;  %p3345_p8 = scmp.ne.s32.totalorder %s3332_s23, 0 }
  0x69   : > { %p2453_p6 = scmp.ne.s32.totalorder %s3284_s5, %s2452_s17  ;;  %p2459_p5 = scmp.lt.u32.totalorder %s2452_s17, %s3284_s5 }
  0x6b   : > { %p2455_p12 = pnand %p2453_p6, %p3345_p8 }
  0x6d   : > { %p2456_p13 = pneg %p2455_p12 }
  0x6f   : > { %p2461_p9 = pnand %p2459_p5, %p2456_p13 }
  0x71   : > { %2464 = shalt.err (!%p2461_p9)
}
  0x72   : > { %s2465_s13 = scalar_lea.vmem %s394_s4, 1536  ;;  %p2473_p7 = scmp.lt.s32.totalorder %s394_s4, %s394_s4 }
  0x73   : > { %p2466_p0 = scmp.ne.s32.totalorder %s394_s4, %s2465_s13  ;;  %p2474_p10 = scmp.lt.s32.totalorder %s2465_s13, %s2465_s13 }
  0x75   : > { %p2468_p2 = pnand %p2466_p0, %p3345_p8  ;;  %p2475_p11 = por %p2474_p10, %p2473_p7 }
  0x77   : > { %p2469_p1 = pneg %p2468_p2 }
  0x79   : > { %p2476_p3 = pnand %p2475_p11, %p2469_p1 }
  0x7b   : > { %2479 = shalt.err (!%p2476_p3)
}
  0x7c   : > { %p3346_p6 = scmp.ne.s32.totalorder %s3330_s16, 0  ;;  %s3347_s8 = smov 8  }
  0x7d   : > { %s3348_s22 = smov 128   ;;  %s432_s25 = sshll.u32 %s3290_s11, 4  ;;  %s433_s25 = int_to_ptr.vmem [resolvable:$true] %s432_s25 }
  0x7e   : > { %2286 = dma.hbm_to_vmem [thread:$0]  (!%p3346_p6), %s3284_s5, 1536, %s394_s4, [#allocation10], %s3348_s22, %s3348_s22, %s3347_s8  }
  0x7f   : > { %s2480_s27 = scalar_lea.hbm %s3286_s7, 1536 }
  0x80   : > { %p2481_p3 = scmp.ne.s32.totalorder %s3286_s7, %s2480_s27  ;;  %p2487_p5 = scmp.lt.u32.totalorder %s2480_s27, %s3286_s7 }
  0x82   : > { %p2483_p12 = pnand %p2481_p3, %p3345_p8 }
  0x84   : > { %p2484_p13 = pneg %p2483_p12 }
  0x86   : > { %p2489_p9 = pnand %p2487_p5, %p2484_p13 }
  0x88   : > { %2492 = shalt.err (!%p2489_p9)
}
  0x89   : > { %s2493_s4 = scalar_lea.vmem %s410_s1, 1536  ;;  %p2501_p7 = scmp.lt.s32.totalorder %s410_s1, %s410_s1 }
  0x8a   : > { %p2494_p0 = scmp.ne.s32.totalorder %s410_s1, %s2493_s4  ;;  %p2502_p10 = scmp.lt.s32.totalorder %s2493_s4, %s2493_s4 }
  0x8c   : > { %p2496_p2 = pnand %p2494_p0, %p3345_p8  ;;  %p2503_p11 = por %p2502_p10, %p2501_p7 }
  0x8e   : > { %p2497_p1 = pneg %p2496_p2 }
  0x90   : > { %p2504_p4 = pnand %p2503_p11, %p2497_p1 }
  0x92   : > { %2507 = shalt.err (!%p2504_p4)
}
  0x93   : > { %2289 = dma.hbm_to_vmem [thread:$0]  (!%p3346_p6), %s3286_s7, 1536, %s410_s1, [#allocation13], %s3348_s22, %s3348_s22, %s3347_s8  }
  0x94   : > { %s2508_s10 = scalar_lea.vmem %s433_s25, 16  ;;  %p2516_p5 = scmp.lt.s32.totalorder %s433_s25, %s433_s25 }
  0x95   : > { %p2509_p3 = scmp.ne.s32.totalorder %s433_s25, %s2508_s10  ;;  %p2517_p9 = scmp.lt.s32.totalorder %s2508_s10, %s2508_s10 }
  0x97   : > { %p2511_p12 = pnand %p2509_p3, %p3345_p8  ;;  %p2518_p0 = por %p2517_p9, %p2516_p5 }
  0x99   : > { %p2512_p13 = pneg %p2511_p12 }
  0x9b   : > { %p2519_p4 = pnand %p2518_p0, %p2512_p13 }
  0x9d   : > { %2522 = shalt.err (!%p2519_p4)
}
  0x9e   : > { %s2705_s30 = smov [#allocation14]   ;;  %s1968_s1 = sshll.u32 %s2882_s19, 4 }
  0x9f   : > { %2292 = dma.vmem_to_smem (!%p3346_p6), %s433_s25, 16, %s2705_s30, [#allocation5]  }
  0xa0   : > { %s2017_s24 = sshll.u32 %s2697_s28, 8  ;;  %s447_s27 = scalar_lea.vmem [#allocation2], %s1968_s1 }
  0xa1   : > { %s2986_s23 = scalar_lea.hbm %s3279_s0, %s2017_s24  ;;  %s454_s13 = sshll.u32 %s447_s27, 4  ;;  %s2988_s13 = int_to_ptr.vmem [resolvable:$true] %s454_s13 }
  0xa2   : > { %s444_s16 = scalar_lea.sflag [#allocation3], %s2882_s19  ;;  %s2523_s6 = scalar_lea.hbm %s2986_s23, 256 }
  0xa3   : > { %p2524_p8 = scmp.ne.s32.totalorder %s2986_s23, %s2523_s6  ;;  %p3349_p2 = scmp.ne.s32.totalorder %s3344_s12, 0 }
  0xa4   : > { %s2528_s2 = scalar_lea.hbm %s3279_s0, 512  ;;  %p2529_p7 = scmp.lt.u32.totalorder %s2986_s23, %s3279_s0 }
  0xa5   : > { %p2526_p6 = pnand %p2524_p8, %p3349_p2  ;;  %p2530_p10 = scmp.lt.u32.totalorder %s2528_s2, %s2523_s6 }
  0xa6   : > { %p2532_p3 = scmp.lt.u32.totalorder %s2523_s6, %s2986_s23 }
  0xa7   : > { %p2527_p1 = pneg %p2526_p6  ;;  %p2531_p11 = por %p2530_p10, %p2529_p7 }
  0xa9   : > { %p2533_p12 = por %p2532_p3, %p2531_p11 }
  0xab   : > { %p2534_p13 = pnand %p2533_p12, %p2527_p1 }
  0xad   : > { %2537 = shalt.err (!%p2534_p13)
}
  0xae   : > { %s2538_s30 = scalar_lea.vmem %s2988_s13, 256  ;;  %s2706_s1 = smov [#allocation2]  }
  0xaf   : > { %p2539_p5 = scmp.ne.s32.totalorder %s2988_s13, %s2538_s30  ;;  %s2543_s24 = sshll.u32 %s2706_s1, 4  ;;  %s2544_s24 = int_to_ptr.vmem [resolvable:$false] %s2543_s24 }
  0xb0   : > { %s2545_s17 = scalar_lea.vmem %s2544_s24, 512  ;;  %p2546_p4 = scmp.lt.s32.totalorder %s2988_s13, %s2544_s24 }
  0xb1   : > { %p2541_p9 = pnand %p2539_p5, %p3349_p2  ;;  %p2547_p8 = scmp.lt.s32.totalorder %s2545_s17, %s2538_s30 }
  0xb3   : > { %p2542_p0 = pneg %p2541_p9  ;;  %p2548_p6 = por %p2547_p8, %p2546_p4 }
  0xb5   : > { %p2549_p7 = pnand %p2548_p6, %p2542_p0 }
  0xb7   : > { %2552 = shalt.err (!%p2549_p7)
}
  0xb8   : > { %p3350_p1 = scmp.ne.s32.totalorder %s3342_s20, 0  ;;  %s1973_s29 = sshll.u32 %s2697_s28, 4 }
  0xb9   : > { %s491_s27 = scalar_lea.vmem [#allocation8], %s2882_s19  ;;  %s496_s2 = scalar_lea.hbm %s3282_s3, %s1973_s29 }
  0xba   : > { %2296 = dma.hbm_to_vmem [thread:$0]  (!%p3350_p1), %s2986_s23, 256, %s2988_s13, %s444_s16, %s3348_s22, %s3348_s22, %s3347_s8  }
  0xbb   : > { %s498_s6 = sshll.u32 %s491_s27, 4  ;;  %s2553_s9 = scalar_lea.hbm %s496_s2, 16  ;;  %s499_s6 = int_to_ptr.vmem [resolvable:$true] %s498_s6 }
  0xbc   : > { %p2554_p10 = scmp.ne.s32.totalorder %s496_s2, %s2553_s9  ;;  %s2558_s1 = scalar_lea.hbm %s3282_s3, 32 }
  0xbd   : > { %p2559_p12 = scmp.lt.u32.totalorder %s496_s2, %s3282_s3  ;;  %p2560_p13 = scmp.lt.u32.totalorder %s2558_s1, %s2553_s9 }
  0xbe   : > { %p2556_p11 = pnand %p2554_p10, %p3349_p2  ;;  %p2562_p9 = scmp.lt.u32.totalorder %s2553_s9, %s496_s2 }
  0xbf   : > { %p2561_p5 = por %p2560_p13, %p2559_p12 }
  0xc0   : > { %p2557_p3 = pneg %p2556_p11 }
  0xc1   : > { %p2563_p0 = por %p2562_p9, %p2561_p5 }
  0xc3   : > { %p2564_p4 = pnand %p2563_p0, %p2557_p3 }
  0xc5   : > { %2567 = shalt.err (!%p2564_p4)
}
  0xc6   : > { %s2568_s19 = scalar_lea.vmem %s499_s6, 16  ;;  %s2707_s8 = smov [#allocation8]  }
  0xc7   : > { %p2569_p8 = scmp.ne.s32.totalorder %s499_s6, %s2568_s19  ;;  %s2573_s22 = sshll.u32 %s2707_s8, 4  ;;  %s2574_s22 = int_to_ptr.vmem [resolvable:$false] %s2573_s22 }
  0xc8   : > { %s2575_s23 = scalar_lea.vmem %s2574_s22, 32  ;;  %p2576_p10 = scmp.lt.s32.totalorder %s499_s6, %s2574_s22 }
  0xc9   : > { %p2571_p6 = pnand %p2569_p8, %p3349_p2  ;;  %p2577_p11 = scmp.lt.s32.totalorder %s2575_s23, %s2568_s19 }
  0xcb   : > { %p2572_p7 = pneg %p2571_p6  ;;  %p2578_p1 = por %p2577_p11, %p2576_p10 }
  0xcd   : > { %p2579_p12 = pnand %p2578_p1, %p2572_p7 }
  0xcf   : > { %2582 = shalt.err (!%p2579_p12)
}
  0xd0   : > { %p3351_p13 = scmp.ne.s32.totalorder %s3342_s20, 0  ;;  %p3352_p3 = scmp.ne.s32.totalorder %s3329_s15, 0 }
  0xd1   : > { %s3038_s12 = sand.u32 (!%p3352_p3), 1, %s2689_s26   ;;  %p3353_p2 = scmp.ne.s32.totalorder (!%p3352_p3), %s3336_s21, 0 }
  0xd2   : > { %2302 = dma.hbm_to_vmem [thread:$0]  (!%p3351_p13), %s496_s2, 16, %s499_s6, %s2902_s18  }
  0xd3   : > { %507 = sbr.rel (%p3352_p3) target bundleno = 1493 (0x5d5), region = 68  ;;  %s1975_s13 = sshll.u32 (!%p3352_p3), %s3038_s12, 4 }
  0xd4   : > { %s510_s16 = scalar_lea.sflag (!%p3352_p3), [#allocation3], %s3038_s12  ;;  %s3044_s29 = scalar_lea.vmem (!%p3352_p3), [#allocation2], %s1975_s13 }
  0xda   : > { %2656 = dma.done.wait (%p3353_p2), %s510_s16, 256  }
  0xdb   : > { %2658 = vsyncadd (%p3353_p2), %s510_s16, 4294967040  ;;  %s518_s15 = sand.u32 1, %s2807_s14   ;;  %s1976_s20 = sshll.u32 %s3038_s12, 3 }
  0xdc   : > { %s519_s18 = scalar_lea.sflag [#allocation7], %s518_s15  ;;  %s3054_s27 = scalar_lea.vmem [#allocation6], %s1976_s20 }
  0xdd   : > { %2660 = dma.done.wait (%p3353_p2), %s519_s18, 144  }
  0xde   : > { %2662 = vsyncadd (%p3353_p2), %s519_s18, 4294967152  ;;  %s530_s6 = scalar_lea.vmem [#allocation8], %s3038_s12  ;;  %p3354_p1 = scmp.eq.s32.totalorder %s2807_s14, 0 }
  0xe0   : > { %2664 = dma.done.wait (%p3354_p1), [#allocation10], 2048   ;;  %p3355_p5 = pmov %p3354_p1 }
  0xe1   : > { %p3356_p9 = pmov %p3354_p1 }
  0xe2   : > { %2666 = vsyncadd (%p3355_p5), [#allocation10], 4294965248 }
  0xe3   : > { %2668 = dma.done.wait (%p3356_p9), [#allocation13], 1536   ;;  %p3357_p0 = pmov %p3354_p1 }
  0xe5   : > { %2670 = vsyncadd (%p3357_p0), [#allocation13], 4294965760  ;;  %p3358_p4 = pmov %p3357_p0 }
  0xe6   : > { %p3359_p8 = pmov %p3357_p0 }
  0xe7   : > { %2672 = dma.done.wait (%p3358_p4), [#allocation5], 16  }
  0xe8   : > { %2674 = vsyncadd (%p3359_p8), [#allocation5], 4294967280 }
  0xe9   : > { %551 = sfence }
  0xea   : > { %v615_v0 = vld [vmem:[#allocation9] sm:$0xff]  ;;  %v616_v1 = vld [vmem:[#allocation9 + $0x8] sm:$0xff]  ;;  %v617_v2 = vld [vmem:[#allocation9 + $0x10] sm:$0xff]  ;;  %v2708_v3 = vmov 0.0|0.0   ;;  %vm2709_vm0 = vmmov 0   ;;  %v2710_v6 = vmov 0.0   ;;  %v933_v19 = vlaneseq }
  0xeb   : > { %2195 = vmatprep.subr.bf16.mxu1 %v2708_v3  ;;  %v2187_v4 = vpack.c.bf16 %v616_v1, %v615_v0  ;;  %v618_v5 = vld [vmem:[#allocation9 + $0x18] sm:$0xff]  ;;  %2094 = vmatprep.mubr.msk.f32.mxu1 %vm2709_vm0, %v2710_v6  ;;  %vm619_vm1 = vcmask 261120   ;;  %p607_p6 = scmp.lt.s32.totalorder %s2807_s14, 1  ;;  %v614_v20 = vld [vmem:[%s530_s6] sm:$0x1]  ;;  %s3360_s2 = sld [smem:[#allocation32_spill]] }
  0xec   : > { %v3077_v7 = vld [vmem:[%s3044_s29] sm:$0xff]  ;;  %v2191_v8 = vpack.c.bf16 %v618_v5, %v617_v2  ;;  %v3086_v10 = vld [vmem:[%s3044_s29 + $0x8] sm:$0xff]  ;;  %vm2203_vm2 = vmpackc.low %vm619_vm1, %vm619_vm1  ;;  %v3109_v21 = vshrl.u32 %v933_v19, 7  ;;  %vm931_vm3 = vcmp.ne.f32.partialorder %v614_v20, 0.0  ;;  %v2711_v23 = vmov 0   ;;  %s3361_s1 = sld [smem:[#allocation36_spill]] }
  0xed   : > { %2083 = vmatprep.mubr.msk.f32.mxu0 %vm619_vm1, %v3077_v7  ;;  %2188 = vmatprep.subr.bf16.mxu0 %v2187_v4  ;;  %v3083_v9 = vld [vmem:[%s3054_s27] sm:$0xff]  ;;  %s608_s21 = scalar_select %p607_p6, %s2807_s14, 1  ;;  %v932_v24 = vsel %vm931_vm3, 1, %v2711_v23  ;;  %vm940_vm6 = vcmask 64512   ;;  %vm971_vm8 = vcmask 130048   ;;  %v1145_v54 = vld [vmem:[#allocation11 + $0x20] sm:$0xff]  ;;  %v2206_v2 = vpack.c.bf16 %v3086_v10, %v3077_v7 }
  0xee   : > { %2197 = vmatpush3.bf16.msra.mxu1 %v2187_v4  ;;  %2190 = vmatpush3.bf16.msra.mxu0 %v2187_v4  ;;  %v3115_v22 = vsub.s32 0, %v3109_v21  ;;  %v1146_v55 = vld [vmem:[#allocation11 + $0x28] sm:$0xff]  ;;  %v1147_v57 = vld [vmem:[#allocation11 + $0x30] sm:$0xff]  ;;  %v1148_v58 = vld [vmem:[#allocation11 + $0x38] sm:$0xff]  ;;  %s3362_s19 = sld [smem:[#allocation37_spill]]  ;;  %s1137_s8 = sld [smem:[#allocation14]] }
  0xef   : > { %2198 = vmatprep.subr.bf16.mxu1 %v2708_v3  ;;  %2192 = vmatprep.subr.bf16.mxu0 %v2191_v8  ;;  %v2208_v56 = vpack.c.bf16 %v1146_v55, %v1145_v54  ;;  %v2212_v59 = vpack.c.bf16 %v1148_v58, %v1147_v57  ;;  %v1463_v5 = vld [vmem:[#allocation12 + $0x20] sm:$0xff]  ;;  %s2004_s22 = sld [smem:[#allocation14 + $0x1]]  ;;  %s3363_s29 = sld [smem:[#allocation34_spill]] }
  0xf0   : > { %v936_v26 = vrot.slane %v932_v24, %v3115_v22  ;;  %s3364_s27 = sld [smem:[#allocation35_spill]]  ;;  %s2018_s6 = sshll.u32 %s2807_s14, 8 }
  0xf1   : > { %s609_s9 = scalar_lea.vmem %s3360_s2, %s608_s21  ;;  %s599_s21 = scalar_lea.vmem [#allocation15], %s1975_s13 }
  0xf2   : > { %2200 = vmatpush3.bf16.msra.mxu1 %v2191_v8  ;;  %2194 = vmatpush3.bf16.msra.mxu0 %v2191_v8  ;;  %v613_v25 = vld [vmem:[%s609_s9] sm:$0x1]  ;;  %vm937_vm5 = vcmp.eq.s32.totalorder %v936_v26, 1  ;;  %s1753_s25 = sshll.u32 %s599_s21, 4  ;;  %s3365_s9 = sld [smem:[#allocation38_spill]]  ;;  %s3195_s25 = int_to_ptr.vmem [resolvable:$true] %s1753_s25 }
  0xf3   : > { %2201 = vmatprep.subr.bf16.mxu1 %v2708_v3  ;;  %vm963_vm4 = vcmp.ne.f32.partialorder %v613_v25, 0.0  ;;  %v1464_v8 = vld [vmem:[#allocation12 + $0x28] sm:$0xff]  ;;  %v1421_v25 = vsub.s32 2, %v3109_v21  ;;  %s3366_s13 = sld [smem:[#allocation29_spill]]  ;;  %s2014_s30 = sshll.u32 %s2807_s14, 7 }
  0xf4   : > { %v964_v27 = vsel %vm963_vm4, 1, %v2711_v23  ;;  %v1404_v20 = vld [vmem:[%s3361_s1] sm:$0x7]  ;;  %v1413_v23 = vsub.s32 1, %v3109_v21  ;;  %s3200_s1 = scalar_lea.vmem [#allocation16], %s1976_s20  ;;  %s1735_s14 = scalar_lea.sflag [#allocation4], %s3038_s12 }
  0xf5   : > { %2095 = vmatmul.mubr.msk.f32.vlgmr.msra.gmra.mrb[0].mxu1 %vm619_vm1, %v3083_v9  ;;  %2084 = vmatmul.mubr.msk.f32.vlgmr.msra.gmra.mrb[0].mxu0 %vm619_vm1, %v3086_v10  ;;  %v968_v30 = vrot.slane %v964_v27, %v3115_v22  ;;  %v1408_v24 = vrot.slane %v1404_v20, %v3115_v22  ;;  %v1698_v26 = vld [vmem:[%s3362_s19] sm:$0x7]  ;;  %s1769_s24 = sshll.u32 %s3200_s1, 4  ;;  %s2583_s20 = scalar_lea.vmem %s3195_s25, 256  ;;  %s3211_s24 = int_to_ptr.vmem [resolvable:$true] %s1769_s24 }
  0xf6   : > { %2106 = vmatprep.mubr.msk.f32.mxu1 %vm2709_vm0, %v2710_v6  ;;  %v1414_v27 = vrot.slane %v1404_v20, %v1413_v23  ;;  %p2584_p7 = scmp.ne.s32.totalorder %s3195_s25, %s2583_s20  ;;  %s2712_s23 = smov [#allocation15]  }
  0xf7   : > { %vm969_vm7 = vcmp.eq.s32.totalorder %v968_v30, 1  ;;  %v1458_v30 = vld [vmem:[#allocation12] sm:$0xff]  ;;  %s2587_s16 = sshll.u32 %s2712_s23, 4  ;;  %s2588_s16 = int_to_ptr.vmem [resolvable:$false] %s2587_s16 }
  0xf8   : > { %s3193_s10 = scalar_lea.hbm %s3365_s9, %s2018_s6  ;;  %p2590_p13 = scmp.lt.s32.totalorder %s3195_s25, %s2588_s16 }
  0xf9   : > { %p3368_p10 = scmp.ne.s32.totalorder %s3366_s13, 0 }
  0xfb   : > { %p2585_p11 = pnand %p2584_p7, %p3368_p10 }
  0xfd   : > { %p2586_p12 = pneg %p2585_p11 }
 0x1c8   : > { %v772_v11 = vpop.f32.mrb[0].mxu1  ;;  %v2085_v13 = vpop.f32.mrb[0].mxu0 }
 0x1c9   : > { %v776_v12 = vmax.f32 %v772_v11, 0.0  ;;  %v2096_v14 = vpop.f32.mrb[1].mxu1  ;;  %v702_v15 = vmax.f32 %v2085_v13, 0.0  ;;  %v692_v16 = vpop.f32.mrb[1].mxu0 }
 0x1ca   : > { %v701_v17 = vmax.f32 %v692_v16, 0.0  ;;  %v1465_v14 = vld [vmem:[#allocation12 + $0x30] sm:$0xff] }
 0x1cb   : > { %2097 = vmatprep.subr.msk.mxu0 %vm619_vm1, %v776_v12 }
 0x1cc   : > { %2098 = vmatpush3.xpose.msk.msra.mxu0 %vm619_vm1, %v776_v12  ;;  %v2202_v18 = vpack.c.bf16 %v702_v15, %v701_v17  ;;  %2099 = vmatprep.mubr.msk.f32.mxu0 %vm619_vm1, %v701_v17  ;;  %v1140_v17 = vld [vmem:[#allocation11] sm:$0xff] }
 0x1cd   : > { %2109 = vmatprep.subr.mxu0 %v3083_v9 }
 0x1ce   : > { %2204 = vmatpush3.bf16.xpose.msk.msra.mxu1 %vm2203_vm2, %v2202_v18  ;;  %v1141_v18 = vld [vmem:[#allocation11 + $0x8] sm:$0xff] }
 0x1cf   : > { %2100 = vmatmul.mubr.msk.f32.vlgmr.msra.gmra.mrb[2].mxu0 %vm619_vm1, %v702_v15  ;;  %2209 = vmatprep.subr.bf16.mxu1 %v2208_v56  ;;  %v1466_v15 = vld [vmem:[#allocation12 + $0x38] sm:$0xff]  ;;  %v2216_v19 = vpack.c.bf16 %v1141_v18, %v1140_v17  ;;  %v1433_v18 = vstv %s1137_s8  ;;  %s3367_s8 = sld [smem:[#allocation39_spill]] }
 0x1d0   : > { %2110 = vmatpush3.msra.mxu0 %v3083_v9  ;;  %v2236_v16 = vpack.c.bf16 %v1466_v15, %v1465_v14  ;;  %v1613_v14 = vld [vmem:[#allocation12 + $0x50] sm:$0xff]  ;;  %v1614_v15 = vld [vmem:[#allocation12 + $0x58] sm:$0xff] }
 0x1d1   : > { %2205 = vmatprep.subr.bf16.mxu0 %v2708_v3 }
 0x1d5   : > { %2107 = vmatmul.mubr.msk.f32.vlgmr.msra.gmra.mrb[2].mxu1 %vm619_vm1, %v776_v12  ;;  %v2233_v12 = vpack.c.bf16 %v1464_v8, %v1463_v5 }
 0x1d6   : > { %2211 = vmatpush3.bf16.msra.mxu1 %v2208_v56 }
 0x1d7   : > { %2213 = vmatprep.subr.bf16.mxu1 %v2212_v59 }
 0x1da   : > { %2215 = vmatpush3.bf16.msra.mxu1 %v2212_v59 }
 0x1db   : > { %2217 = vmatprep.subr.bf16.mxu1 %v2216_v19 }
 0x2a2   : > { %v2101_v28 = vpop.f32.mrb[2].mxu0 }
 0x2a3   : > { %v852_v29 = vpop.f32.mrb[3].mxu0  ;;  %v939_v33 = vsel %vm937_vm5, %v2101_v28, -1e+30  ;;  %v1142_v28 = vld [vmem:[#allocation11 + $0x10] sm:$0xff] }
 0x2a4   : > { %v938_v31 = vsel %vm937_vm5, %v852_v29, -1e+30  ;;  %v944_v35 = vsel %vm940_vm6, %v939_v33, -inf  ;;  %v1143_v29 = vld [vmem:[#allocation11 + $0x18] sm:$0xff] }
 0x2a5   : > { %v941_v32 = vsel %vm940_vm6, %v938_v31, -inf }
 0x2a6   : > { %942 = vmax.xlane.f32.xlu0 %v941_v32  ;;  %v1410_v32 = vmul.f32 %v1408_v24, %v3086_v10 }
 0x2a8   : > { %v927_v34 = vpop.f32.mrb[2].mxu1 }
 0x2a9   : > { %v970_v36 = vsel %vm969_vm7, %v927_v34, -1e+30  ;;  %v2108_v37 = vpop.f32.mrb[3].mxu1  ;;  %v1702_v34 = vrot.slane %v1698_v26, %v3115_v22 }
 0x2aa   : > { %945 = vmax.xlane.f32.xlu0 %v944_v35  ;;  %v972_v38 = vsel %vm971_vm8, %v970_v36, -inf }
 0x2ab   : > { %973 = vmax.xlane.f32.xlu1 %v972_v38 }
 0x333   : > { %v943_v39 = vpop.xlane.xlu0 %942 }
 0x334   : > { %v947_v40 = vsub.f32 %v938_v31, %v943_v39  ;;  %v1459_v31 = vld [vmem:[#allocation12 + $0x8] sm:$0xff]  ;;  %v1707_v39 = vrot.slane %v1698_v26, %v1413_v23 }
 0x336   : > { %v949_v41 = vmul.f32 1.442695, %v947_v40  ;;  %v2220_v40 = vpack.c.bf16 %v1143_v29, %v1142_v28 }
 0x337   : > { %v946_v42 = vpop.xlane.xlu0 %945 }
 0x338   : > { %2364 = vpow2.f32 %v949_v41  ;;  %v948_v43 = vsub.f32 %v939_v33, %v946_v42  ;;  %v974_v44 = vpop.xlane.xlu1 %973  ;;  %v1422_v33 = vrot.slane %v1404_v20, %v1421_v25  ;;  %v1306_v41 = vld [vmem:[#allocation11 + $0x40] sm:$0xff]  ;;  %v1307_v42 = vld [vmem:[#allocation11 + $0x48] sm:$0xff] }
 0x339   : > { %v975_v46 = vsub.f32 %v970_v36, %v974_v44  ;;  %v1409_v36 = vmul.f32 %v1408_v24, %v3077_v7  ;;  %v2224_v54 = vpack.c.bf16 %v1307_v42, %v1306_v41  ;;  %v1719_v24 = vstv %s2004_s22  ;;  %s3209_s22 = scalar_lea.hbm %s3367_s8, %s2014_s30 }
 0x33a   : > { %v951_v45 = vmul.f32 1.442695, %v948_v43 }
 0x33b   : > { %v976_v47 = vmul.f32 1.442695, %v975_v46 }
 0x33c   : > { %2366 = vpow2.f32 %v951_v45  ;;  %v2239_v45 = vpack.c.bf16 %v1459_v31, %v1458_v30 }
 0x33d   : > { %2368 = vpow2.f32 %v976_v47  ;;  %v1460_v47 = vld [vmem:[#allocation12 + $0x10] sm:$0xff] }
 0x342   : > { %v2365_v48 = vpop.eup %2364 }
 0x343   : > { %v953_v49 = vsel %vm940_vm6, %v2365_v48, 0.0 }
 0x344   : > { %954 = vadd.xlane.f32.xlu1 %v953_v49  ;;  %v1703_v49 = vmul.f32 %v1702_v34, %v3083_v9 }
 0x346   : > { %v2367_v50 = vpop.eup %2366 }
 0x347   : > { %v956_v51 = vsel %vm940_vm6, %v2367_v50, 0.0  ;;  %v2369_v52 = vpop.eup %2368 }
 0x348   : > { %957 = vadd.xlane.f32.xlu0 %v956_v51  ;;  %v978_v53 = vsel %vm971_vm8, %v2369_v52, 0.0 }
 0x349   : > { %979 = vadd.xlane.f32.xlu1 %v978_v53 }
 0x3d1   : > { %v955_v60 = vpop.xlane.xlu1 %954 }
 0x3d2   : > { %2370 = vrcp.f32 %v955_v60 }
 0x3d5   : > { %v958_v61 = vpop.xlane.xlu0 %957 }
 0x3d6   : > { %2372 = vrcp.f32 %v958_v61  ;;  %v980_v62 = vpop.xlane.xlu1 %979  ;;  %v1611_v61 = vld [vmem:[#allocation12 + $0x40] sm:$0xff] }
 0x3d7   : > { %2374 = vrcp.f32 %v980_v62 }
 0x3dc   : > { %v2371_v63 = vpop.eup %2370 }
 0x3dd   : > { %v961_v0 = vmul.f32 %v2371_v63, %v2365_v48  ;;  %v1461_v48 = vld [vmem:[#allocation12 + $0x18] sm:$0xff]  ;;  %v1612_v63 = vld [vmem:[#allocation12 + $0x48] sm:$0xff] }
 0x3de   : > { %v2242_v60 = vpack.c.bf16 %v1461_v48, %v1460_v47 }
 0x3df   : > { %2111 = vmatprep.mubr.msk.f32.mxu0 %vm940_vm6, %v961_v0 }
 0x3e0   : > { %v2373_v1 = vpop.eup %2372 }
 0x3e1   : > { %v962_v4 = vmul.f32 %v2373_v1, %v2367_v50  ;;  %v2375_v11 = vpop.eup %2374  ;;  %v1713_v50 = vrot.slane %v1698_v26, %v1421_v25 }
 0x3e2   : > { %v982_v13 = vmul.f32 %v2375_v11, %v2369_v52  ;;  %v2245_v11 = vpack.c.bf16 %v1612_v63, %v1611_v61 }
 0x3e3   : > { %2112 = vmatmul.mubr.msk.f32.vlgmr.msra.gmra.mrb[4].mxu0 %vm940_vm6, %v962_v4  ;;  %v1309_v4 = vld [vmem:[#allocation11 + $0x58] sm:$0xff] }
 0x3e4   : > { %2207 = vmatpush3.bf16.msra.mxu0 %v2206_v2  ;;  %2118 = vmatprep.mubr.msk.f32.mxu0 %vm2709_vm0, %v2710_v6  ;;  %v1308_v2 = vld [vmem:[#allocation11 + $0x50] sm:$0xff] }
 0x3e5   : > { %2232 = vmatprep.subr.bf16.mxu0 %v2708_v3 }
 0x3e7   : > { %2119 = vmatmul.mubr.msk.f32.vlgmr.msra.gmra.mrb[6].mxu0 %vm971_vm8, %v982_v13 }
 0x3e8   : > { %2234 = vmatpush3.bf16.msra.mxu0 %v2233_v12  ;;  %2162 = vmatprep.mubr.msk.f32.mxu0 %vm2709_vm0, %v2710_v6  ;;  %v2228_v12 = vpack.c.bf16 %v1309_v4, %v1308_v2 }
 0x3e9   : > { %2235 = vmatprep.subr.bf16.mxu0 %v2708_v3 }
 0x3ec   : > { %2237 = vmatpush3.bf16.msra.mxu0 %v2236_v16  ;;  %v2248_v16 = vpack.c.bf16 %v1614_v15, %v1613_v14 }
 0x3ed   : > { %2238 = vmatprep.subr.bf16.mxu0 %v2708_v3 }
 0x4b6   : > { %v2113_v35 = vpop.f32.mrb[4].mxu0 }
 0x4b7   : > { %v3150_v37 = vmul.f32 %v2113_v35, %v3086_v10  ;;  %v1416_v21 = vmul.f32 %v2113_v35, %v1414_v27  ;;  %v1055_v38 = vpop.f32.mrb[5].mxu0 }
 0x4b8   : > { %v1138_v43 = vmul.f32 %v1055_v38, %v3077_v7  ;;  %v1415_v44 = vmul.f32 %v1414_v27, %v1055_v38  ;;  %2129 = vmatprep.mubr.msk.f32.mxu1 %vm619_vm1, %v1055_v38  ;;  %v2001_v38 = vld [vmem:[%s3363_s29] ss:$0 sm:$0xff]  ;;  %s2589_s29 = scalar_lea.vmem %s2588_s16, 512 }
 0x4b9   : > { %2130 = vmatmul.mubr.msk.f32.vlgmr.msra.gmra.mrb[4].mxu1 %vm619_vm1, %v2113_v35  ;;  %v1418_v22 = vadd.f32 %v1416_v21, %v1410_v32  ;;  %v1424_v46 = vmul.f32 %v1422_v33, %v3150_v37  ;;  %p2591_p3 = scmp.lt.s32.totalorder %s2589_s29, %s2583_s20 }
 0x4ba   : > { %v1133_v51 = vpop.f32.mrb[6].mxu0  ;;  %2219 = vmatpush3.bf16.msra.mxu1 %v2216_v19  ;;  %v1417_v52 = vadd.f32 %v1415_v44, %v1409_v36  ;;  %v1423_v53 = vmul.f32 %v1422_v33, %v1138_v43  ;;  %2140 = vmatprep.mubr.msk.f32.mxu1 %vm619_vm1, %v3077_v7  ;;  %v2008_v44 = vld [vmem:[%s3364_s27] ss:$0 sm:$0xff] }
 0x4bb   : > { %v1457_v55 = vmul.f32 %v1133_v51, %v3083_v9  ;;  %v1708_v56 = vmul.f32 %v1707_v39, %v1133_v51  ;;  %v2120_v57 = vpop.f32.mrb[7].mxu0  ;;  %2163 = vmatmul.mubr.msk.f32.vlgmr.msra.gmra.mrb[8].mxu0 %vm619_vm1, %v1133_v51  ;;  %2221 = vmatprep.subr.bf16.mxu1 %v2220_v40  ;;  %v1426_v58 = vadd.f32 %v1424_v46, %v1418_v22  ;;  %p2592_p2 = por %p2591_p3, %p2590_p13 }
 0x4bc   : > { %2240 = vmatpush3.bf16.msra.mxu0 %v2239_v45  ;;  %v1425_v59 = vadd.f32 %v1423_v53, %v1417_v52  ;;  %2173 = vmatprep.mubr.msk.f32.mxu0 %vm2709_vm0, %v2710_v6 }
 0x4bd   : > { %v1430_v62 = vsel %vm619_vm1, %v1426_v58, 0.0  ;;  %2241 = vmatprep.subr.bf16.mxu0 %v2708_v3  ;;  %v1709_v0 = vadd.f32 %v1708_v56, %v1703_v49  ;;  %v1714_v1 = vmul.f32 %v1713_v50, %v1457_v55  ;;  %p2593_p1 = pnand %p2592_p2, %p2586_p12 }
 0x4be   : > { %1431 = vadd.xlane.f32.xlu1 %v1430_v62  ;;  %2223 = vmatpush3.bf16.msra.mxu1 %v2220_v40  ;;  %v1427_v5 = vsel %vm619_vm1, %v1425_v59, 0.0 }
 0x4bf   : > { %1428 = vadd.xlane.f32.xlu0 %v1427_v5  ;;  %2225 = vmatprep.subr.bf16.mxu1 %v2224_v54  ;;  %v1715_v8 = vadd.f32 %v1714_v1, %v1709_v0 }
 0x4c0   : > { %2243 = vmatpush3.bf16.msra.mxu0 %v2242_v60 }
 0x4c1   : > { %2141 = vmatmul.mubr.msk.f32.vlgmr.msra.gmra.mrb[4].mxu1 %vm619_vm1, %v3086_v10  ;;  %2244 = vmatprep.subr.bf16.mxu0 %v2708_v3  ;;  %v1716_v13 = vsel %vm619_vm1, %v1715_v8, 0.0 }
 0x4c2   : > { %2227 = vmatpush3.bf16.msra.mxu1 %v2224_v54  ;;  %2151 = vmatprep.mubr.msk.f32.mxu1 %vm619_vm1, %v1138_v43 }
 0x4c3   : > { %2174 = vmatmul.mubr.msk.f32.vlgmr.msra.gmra.mrb[10].mxu0 %vm619_vm1, %v3083_v9  ;;  %1717 = vadd.xlane.f32.xlu0 %v1716_v13 }
 0x4c4   : > { %2246 = vmatpush3.bf16.msra.mxu0 %v2245_v11  ;;  %2229 = vmatprep.subr.bf16.mxu1 %v2228_v12 }
 0x4c5   : > { %2247 = vmatprep.subr.bf16.mxu0 %v2708_v3  ;;  %2184 = vmatprep.mubr.msk.f32.mxu0 %vm2709_vm0, %v2710_v6 }
 0x4c6   : > { %2231 = vmatpush3.bf16.msra.mxu1 %v2228_v12 }
 0x4c8   : > { %2249 = vmatpush3.bf16.msra.mxu0 %v2248_v16 }
 0x4c9   : > { %2152 = vmatmul.mubr.msk.f32.vlgmr.msra.gmra.mrb[4].mxu1 %vm619_vm1, %v3150_v37 }
 0x4cb   : > { %2185 = vmatmul.mubr.msk.f32.vlgmr.msra.gmra.mrb[12].mxu0 %vm619_vm1, %v1457_v55 }
 0x54b   : > { %v1432_v19 = vpop.xlane.xlu1 %1431 }
 0x54c   : > { %v1429_v17 = vpop.xlane.xlu0 %1428  ;;  %v1435_v20 = vadd.f32 %v1433_v18, %v1432_v19 }
 0x54d   : > { %v1434_v23 = vadd.f32 %v1433_v18, %v1429_v17 }
 0x54e   : > { %v2003_v3 = vmul.f32 -1.442695, %v1435_v20 }
 0x54f   : > { %v2002_v27 = vmul.f32 -1.442695, %v1434_v23 }
 0x550   : > { %v1718_v25 = vpop.xlane.xlu0 %1717  ;;  %2376 = vpow2.f32 %v2003_v3 }
 0x551   : > { %v1720_v26 = vadd.f32 %v1719_v24, %v1718_v25  ;;  %2378 = vpow2.f32 %v2002_v27 }
 0x553   : > { %v2009_v6 = vmul.f32 -1.442695, %v1720_v26 }
 0x555   : > { %2380 = vpow2.f32 %v2009_v6 }
 0x55a   : > { %v2377_v30 = vpop.eup %2376 }
 0x55b   : > { %v2379_v31 = vpop.eup %2378  ;;  %v1443_v32 = vadd.f32 1.0, %v2377_v30 }
 0x55c   : > { %v1442_v34 = vadd.f32 1.0, %v2379_v31 }
 0x55d   : > { %2382 = vrcp.f32 %v1443_v32 }
 0x55e   : > { %2384 = vrcp.f32 %v1442_v34 }
 0x55f   : > { %v2381_v33 = vpop.eup %2380 }
 0x560   : > { %v1724_v21 = vadd.f32 1.0, %v2381_v33 }
 0x562   : > { %2386 = vrcp.f32 %v1724_v21 }
 0x567   : > { %v2383_v47 = vpop.eup %2382 }
 0x568   : > { %v2385_v48 = vpop.eup %2384  ;;  %v1451_v49 = vsub.f32 1.0, %v2383_v47 }
 0x569   : > { %v1450_v51 = vsub.f32 1.0, %v2385_v48 }
 0x56a   : > { %v1453_v55 = vmul.f32 %v1451_v49, %v3086_v10 }
 0x56b   : > { %v1452_v58 = vmul.f32 %v1450_v51, %v3077_v7 }
 0x56c   : > { %v2387_v50 = vpop.eup %2386 }
 0x56d   : > { %v1728_v56 = vsub.f32 1.0, %v2387_v50 }
 0x56f   : > { %v1729_v61 = vmul.f32 %v1728_v56, %v3083_v9 }
 0x58e   : > { %v1536_v28 = vpop.f32.mrb[8].mxu0 }
 0x58f   : > { %v2164_v29 = vpop.f32.mrb[9].mxu0 }
 0x596   : > { %v1606_v35 = vpop.f32.mrb[10].mxu0 }
 0x597   : > { %v1607_v36 = vadd.f32 %v1606_v35, %v1536_v28  ;;  %v2175_v37 = vpop.f32.mrb[11].mxu0 }
 0x59c   : > { %v2153_v39 = vpop.f32.mrb[4].mxu1 }
 0x59d   : > { %v1401_v40 = vadd.f32 %v2153_v39, %v2001_v38  ;;  %v1382_v41 = vpop.f32.mrb[5].mxu1 }
 0x59e   : > { %v1400_v42 = vadd.f32 %v2001_v38, %v1382_v41  ;;  %v1684_v43 = vpop.f32.mrb[12].mxu0 }
 0x59f   : > { %2388 = vtanh.f32 %v1401_v40  ;;  %v1688_v45 = vadd.f32 %v1684_v43, %v1607_v36  ;;  %v2186_v22 = vpop.f32.mrb[13].mxu0 }
 0x5a0   : > { %2390 = vtanh.f32 %v1400_v42 }
 0x5a1   : > { %v1696_v46 = vadd.f32 %v2008_v44, %v1688_v45 }
 0x5a3   : > { %2392 = vtanh.f32 %v1696_v46 }
 0x5a9   : > { %v2389_v52 = vpop.eup %2388 }
 0x5aa   : > { %v2391_v53 = vpop.eup %2390  ;;  %v1449_v54 = vmul.f32 %v2389_v52, %v2383_v47 }
 0x5ab   : > { %v1448_v57 = vmul.f32 %v2391_v53, %v2385_v48 }
 0x5ac   : > { %v1455_v59 = vadd.f32 %v1453_v55, %v1449_v54 }
 0x5ad   : > { %v2393_v10 = vpop.eup %2392  ;;  %v1454_v60 = vadd.f32 %v1452_v58, %v1448_v57 }
 0x5ae   : > { %1732 = vst.msk [vmem:[%s599_s21 + $0x8] sm:$0xff] %vm619_vm1, %v1455_v59  ;;  %v1727_v7 = vmul.f32 %v2393_v10, %v2387_v50 }
 0x5af   : > { %1731 = vst.msk [vmem:[%s599_s21] sm:$0xff] %vm619_vm1, %v1454_v60 }
 0x5b0   : > { %2596 = shalt.err (!%p2593_p1)
}
 0x5b1   : > { %s2597_s15 = scalar_lea.hbm %s3193_s10, 256  ;;  %s2601_s6 = scalar_lea.hbm %s3365_s9, 512 }
 0x5b2   : > { %p2598_p5 = scmp.ne.s32.totalorder %s3193_s10, %s2597_s15  ;;  %p2602_p4 = scmp.lt.u32.totalorder %s3193_s10, %s3365_s9 }
 0x5b3   : > { %p2603_p8 = scmp.lt.u32.totalorder %s2601_s6, %s2597_s15  ;;  %p2605_p7 = scmp.lt.u32.totalorder %s2597_s15, %s3193_s10 }
 0x5b4   : > { %p2599_p9 = pnand %p2598_p5, %p3368_p10 }
 0x5b5   : > { %p2604_p6 = por %p2603_p8, %p2602_p4 }
 0x5b6   : > { %p2600_p0 = pneg %p2599_p9 }
 0x5b7   : > { %p2606_p11 = por %p2605_p7, %p2604_p6 }
 0x5b9   : > { %p2607_p12 = pnand %p2606_p11, %p2600_p0 }
 0x5bb   : > { %2610 = shalt.err (!%p2607_p12)
}
 0x5bc   : > { %s2713_s2 = smov 128   ;;  %s2714_s30 = smov 8   ;;  %v1730_v9 = vadd.f32 %v1729_v61, %v1727_v7 }
 0x5bd   : > { %2276 = dma.vmem_to_hbm [thread:$0]  (%p3368_p10), %s3195_s25, 256, %s3193_s10, %s1735_s14, %s2713_s2, %s2713_s2, %s2714_s30  }
 0x5be   : > { %1733 = vst.msk [vmem:[%s3200_s1] sm:$0xff] %vm619_vm1, %v1730_v9  ;;  %s1740_s17 = scalar_lea.sflag [#allocation17], %s3038_s12  ;;  %s2611_s19 = scalar_lea.vmem %s3211_s24, 128 }
 0x5bf   : > { %p2612_p13 = scmp.ne.s32.totalorder %s3211_s24, %s2611_s19  ;;  %s2715_s20 = smov [#allocation16]  }
 0x5c0   : > { %s2615_s23 = sshll.u32 %s2715_s20, 4  ;;  %s2616_s23 = int_to_ptr.vmem [resolvable:$false] %s2615_s23 }
 0x5c1   : > { %p2613_p3 = pnand %p2612_p13, %p3368_p10  ;;  %s2617_s16 = scalar_lea.vmem %s2616_s23, 256 }
 0x5c2   : > { %p2618_p1 = scmp.lt.s32.totalorder %s3211_s24, %s2616_s23  ;;  %p2619_p5 = scmp.lt.s32.totalorder %s2617_s16, %s2611_s19 }
 0x5c3   : > { %p2614_p2 = pneg %p2613_p3 }
 0x5c4   : > { %p2620_p9 = por %p2619_p5, %p2618_p1 }
 0x5c6   : > { %p2621_p0 = pnand %p2620_p9, %p2614_p2 }
 0x5c8   : > { %2624 = shalt.err (!%p2621_p0)
}
 0x5c9   : > { %s2625_s12 = scalar_lea.hbm %s3209_s22, 128  ;;  %s2629_s1 = scalar_lea.hbm %s3367_s8, 256 }
 0x5ca   : > { %p2626_p4 = scmp.ne.s32.totalorder %s3209_s22, %s2625_s12  ;;  %p2630_p7 = scmp.lt.u32.totalorder %s3209_s22, %s3367_s8 }
 0x5cb   : > { %p2631_p11 = scmp.lt.u32.totalorder %s2629_s1, %s2625_s12  ;;  %p2633_p13 = scmp.lt.u32.totalorder %s2625_s12, %s3209_s22 }
 0x5cc   : > { %p2627_p8 = pnand %p2626_p4, %p3368_p10 }
 0x5cd   : > { %p2632_p12 = por %p2631_p11, %p2630_p7 }
 0x5ce   : > { %p2628_p6 = pneg %p2627_p8 }
 0x5cf   : > { %p2634_p3 = por %p2633_p13, %p2632_p12 }
 0x5d1   : > { %p2635_p2 = pnand %p2634_p3, %p2628_p6 }
 0x5d3   : > { %2638 = shalt.err (!%p2635_p2)
}
 0x5d4   : > { %2277 = dma.vmem_to_hbm [thread:$0]  (%p3368_p10), %s3211_s24, 128, %s3209_s22, %s1740_s17  }
 0x5d5 PF: > { %s3369_s15 = sld [smem:[#allocation25_spill]]  ;;  %s3370_s18 = sld [smem:[#allocation30_spill]] }
 0x5d6   : > { %p3372_p5 = scmp.ge.s32.totalorder %s2697_s28, 2 }
 0x5db   : > { %s1781_s27 = sand.u32 1, %s3369_s15   ;;  %p3371_p1 = scmp.ne.s32.totalorder %s3370_s18, 0 }
 0x5dc   : > { %s1782_s6 = scalar_lea.sflag [#allocation4], %s1781_s27 }
 0x5dd   : > { %p2304_p9 = pnand %p3372_p5, %p3371_p1 }
 0x5df   : > { %2676 = dma.done.wait (!%p2304_p9), %s1782_s6, 256  }
 0x5e0   : > { %2678 = vsyncadd (!%p2304_p9), %s1782_s6, 4294967040  ;;  %s1791_s21 = scalar_lea.sflag [#allocation17], %s1781_s27 }
 0x5e1   : > { %2680 = dma.done.wait (!%p2304_p9), %s1791_s21, 128  }
 0x5e2   : > { %2682 = vsyncadd (!%p2304_p9), %s1791_s21, 4294967168  ;;  %s3373_s28 = sld [smem:[#allocation27_spill]]  ;;  %s3374_s13 = sld [smem:[#allocation26_spill]] }
 0x5e3   : > { %s3375_s27 = sld [smem:[#allocation28_spill]]  ;;  %s3376_s25 = smov %s2689_s26 }
 0x5e8   : > { %p36_p10 = scmp.ge.s32.totalorder %s3373_s28, 4   ;;  %s3377_s26 = smov %s3374_s13 }
 0x5ea   :  { %38 = sbr.rel (!%p36_p10) target bundleno = 22 (0x16), region = 178 }
 0x5f1   :  { %1796 = vsyncpa [#allocation3], 1 }
 0x5f2   :  { %1798 = vsyncpa [#allocation3 + $0x1], 1 }
 0x5f3   :  { %1799 = vsyncpa [#allocation7], 1 }
 0x5f4   :  { %1801 = vsyncpa [#allocation7 + $0x1], 1 }
 0x5f5   :  { %1802 = vsyncpa [#allocation10], 1 }
 0x5f6   :  { %1803 = vsyncpa [#allocation13], 1 }
 0x5f7   :  { %1804 = vsyncpa [#allocation4], 1 }
 0x5f8   :  { %1806 = vsyncpa [#allocation4 + $0x1], 1 }
 0x5f9   :  { %1807 = vsyncpa [#allocation17], 1 }
 0x5fa   :  { %1809 = vsyncpa [#allocation17 + $0x1], 1 }
 0x5fb   :  { %1810 = vsyncpa [#allocation5], 1 }
 0x5fc   :  { %1812 = vsyncpa [#allocation5 + $0x1], 1 }

</bundles_post_ra>
